<compile_context>
chip_gen: v5e
topology: v5e:2x2
jax: 0.10.0
libtpu: 0.0.40
codegen_flags: <defaults>
</compile_context>

<pallas_src>
import functools

import jax
import jax.numpy as jnp
from jax.experimental import pallas as pl
from jax.experimental.pallas import tpu as pltpu


def sl_attention_kernel(V_ref, Q_ref, Qws_ref, aux_ref, v_out_ref, q_out_ref,
                        *, v_seq):
    V = V_ref[...]            # (TB, v_seq, v_dim)
    Q = Q_ref[...]            # (TB, q_seq, q_dim)
    Qws = Qws_ref[...]        # (TB, q_seq, v_dim) = (Q @ w_b) * (1 + exp(-theta*time))
    aux = aux_ref[...]        # (TB, v_seq + q_seq) = [V @ w_v | Q @ w_q]
    hv = aux[:, :v_seq]       # (TB, v_seq)
    hq = aux[:, v_seq:]       # (TB, q_seq)

    # C[b] = tanh((Q @ w_b @ V^T) * (1 + pos_decay)); the decay scale is folded
    # into Qws in the wrapper -> one batched MXU contraction over the feature dim
    # (operands consumed as A@B^T, no in-kernel transposes).
    C = jnp.tanh(jnp.einsum('tqd,tvd->tqv', Qws, V,
                            preferred_element_type=jnp.float32))   # (TB, q_seq, v_seq)

    # hq_1 @ C has identical rows -> weighted sublane reduction (VPU + XLU, no MXU).
    wrow = jnp.sum(hq[:, :, None] * C, axis=1)                     # (TB, v_seq)
    # hv_1 @ C^T == outer(hv, rowsum(C)) -> lane reduction (XLU, no ones matvec).
    rs = jnp.sum(C, axis=2)                                        # (TB, q_seq)

    # Implicit broadcasting instead of materialized broadcast_to / transposes.
    h_v = jnp.tanh(hv[:, :, None] + wrow[:, None, :])              # (TB, v_seq, v_seq)
    h_q = jnp.tanh(hq[:, None, :] + hv[:, :, None] * rs[:, None, :])  # (TB, v_seq, q_seq)

    a_v = jax.nn.softmax(h_v, axis=-1).astype(V.dtype)
    a_q = jax.nn.softmax(h_q, axis=-1).astype(Q.dtype)

    v_out_ref[...] = jnp.einsum('tij,tjd->tid', a_v, V,
                                preferred_element_type=jnp.float32)
    q_out_ref[...] = jnp.einsum('tij,tjd->tid', a_q, Q,
                                preferred_element_type=jnp.float32)


def _choose_block_b(B, block_b):
    """Pick the per-step batch block TB.

    Prefers an even grid of >= 2 steps (keeps both v7x TensorCores busy under
    dimension_semantics=("parallel",)) while keeping the block as large as
    possible (amortizes the ~600-cycle per-step overhead on v5e/v6e)."""
    if B <= 8:
        return B                          # tiny batch: one step, block == batch
    tb = min(block_b, B)
    tb = max(8, (tb // 8) * 8)            # multiple of 8 keeps the 2D aux block legal
    if pl.cdiv(B, tb) == 1:               # would be a 1-step grid -> split in two
        tb = max(8, (pl.cdiv(B, 2) + 7) // 8 * 8)
    grid_n = pl.cdiv(B, tb)
    if grid_n > 1 and grid_n % 2 == 1:    # odd grid: nudge to an even step count
        tb2 = max(8, (pl.cdiv(B, grid_n + 1) + 7) // 8 * 8)
        if pl.cdiv(B, tb2) % 2 == 0:
            tb = tb2
    return tb


def sl_attention(V, Q, time, usr_prof, params, *, block_b=128, use_bf16_mxu=False):
    B, v_seq, v_dim = V.shape
    Bq, q_seq, q_dim = Q.shape
    assert Bq == B and time.shape == (B, q_seq)

    w_b = params["w_b"][0]                                        # (q_dim, v_dim)

    # ---- batched precompute hoisted out of the kernel (plain XLA matmuls) ----
    h1 = jax.nn.leaky_relu(usr_prof @ params["fc1_w"].T + params["fc1_b"])
    theta = jax.nn.leaky_relu(h1 @ params["fc2_w"].T + params["fc2_b"])   # (B, 1)
    scale = 1.0 + jnp.exp(-theta * time)                          # (B, q_seq)
    # Fold the per-(b,q) decay scale into Qw: (Qw*scale) @ V^T == (Qw @ V^T)*scale.
    Qws = jnp.einsum('bqd,de->bqe', Q, w_b) * scale[:, :, None]   # (B, q_seq, v_dim)
    # Lane-packed rank-1 terms: [V @ w_v | Q @ w_q] as one small 2D input.
    aux = jnp.concatenate([(V @ params["w_v"])[..., 0],
                           (Q @ params["w_q"])[..., 0]], axis=-1)  # (B, v_seq + q_seq)

    # Optionally feed the MXU bf16 operands (halves HBM/VMEM for the big streams;
    # forfeits exact f32 parity with the PyTorch module -- gate on accuracy).
    mxu_dtype = jnp.bfloat16 if use_bf16_mxu else V.dtype
    V_k, Q_k, Qws_k = (x.astype(mxu_dtype) for x in (V, Q, Qws))
    aux_k = aux.astype(jnp.float32)

    # ---- batch blocking: TB batch elements per grid step ----
    TB = _choose_block_b(B, block_b)
    B_pad = pl.cdiv(B, TB) * TB
    ins = (V_k, Q_k, Qws_k, aux_k)
    if B_pad != B:
        ins = tuple(jnp.pad(x, ((0, B_pad - B),) + ((0, 0),) * (x.ndim - 1))
                    for x in ins)
    V_k, Q_k, Qws_k, aux_k = ins

    grid = (B_pad // TB,)
    in_specs = [
        pl.BlockSpec((TB, v_seq, v_dim), lambda b: (b, 0, 0)),     # V
        pl.BlockSpec((TB, q_seq, q_dim), lambda b: (b, 0, 0)),     # Q
        pl.BlockSpec((TB, q_seq, v_dim), lambda b: (b, 0, 0)),     # Qw * scale
        pl.BlockSpec((TB, v_seq + q_seq), lambda b: (b, 0)),       # [hv | hq]
    ]
    out_specs = [
        pl.BlockSpec((TB, v_seq, v_dim), lambda b: (b, 0, 0)),
        pl.BlockSpec((TB, v_seq, q_dim), lambda b: (b, 0, 0)),
    ]
    out_shape = [
        jax.ShapeDtypeStruct((B_pad, v_seq, v_dim), jnp.float32),
        jax.ShapeDtypeStruct((B_pad, v_seq, q_dim), jnp.float32),
    ]

    kernel = functools.partial(sl_attention_kernel, v_seq=v_seq)
    v_out, q_out = pl.pallas_call(
        kernel,
        grid=grid,
        in_specs=in_specs,
        out_specs=out_specs,
        out_shape=out_shape,
        compiler_params=pltpu.CompilerParams(
            dimension_semantics=("parallel",),
            # Large-TB double-buffered footprint (~8 MiB at TB=128) with headroom;
            # raises v5e's 16 MiB default scoped limit, safe on v6e/v7x.
            vmem_limit_bytes=32 * 1024 * 1024,
        ),
    )(V_k, Q_k, Qws_k, aux_k)

    return v_out[:B], q_out[:B]


def sl_attention_reference(V, Q, time, usr_prof, params):
    """Pure-JAX reference mirroring the PyTorch forward."""
    B, v_seq, _ = V.shape
    _, q_seq, _ = Q.shape
    w_b = params["w_b"]                                           # (1, q_dim, v_dim)
    C1 = jnp.einsum('bqd,de,bse->bqs', Q, w_b[0], V)
    h1 = jax.nn.leaky_relu(usr_prof @ params["fc1_w"].T + params["fc1_b"])
    theta = jax.nn.leaky_relu(h1 @ params["fc2_w"].T + params["fc2_b"])   # (B, 1)
    pos = jnp.repeat(time[:, :, None], v_seq, axis=2)              # (B, q_seq, v_seq)
    pos_decay = jnp.exp(-theta[:, :, None] * pos)
    C = jnp.tanh(C1 * pos_decay + C1)
    hv_1 = jnp.broadcast_to(V @ params["w_v"], (B, v_seq, v_seq))
    hq_1 = jnp.broadcast_to(jnp.swapaxes(Q @ params["w_q"], 1, 2), (B, v_seq, q_seq))
    h_v = jnp.tanh(hv_1 + hq_1 @ C)
    h_q = jnp.tanh(hq_1 + hv_1 @ jnp.swapaxes(C, 1, 2))
    a_v = jax.nn.softmax(h_v, axis=-1)
    a_q = jax.nn.softmax(h_q, axis=-1)
    return a_v @ V, a_q @ Q


if __name__ == "__main__":
    # Small shapes consistent with the module's forward.
    B = 32
    v_dim = 32
    q_dim = 32
    v_seq_len = 8
    his_max = 8            # q_seq_len
    hidden_size = 32

    key = jax.random.PRNGKey(0)
    ks = jax.random.split(key, 11)

    params = {
        "w_b":   jax.random.normal(ks[0], (1, q_dim, v_dim), jnp.float32) * 0.01,
        "fc1_w": jax.random.normal(ks[1], (32, hidden_size), jnp.float32) * 0.1,
        "fc1_b": jax.random.normal(ks[2], (32,), jnp.float32) * 0.1,
        "fc2_w": jax.random.normal(ks[3], (1, 32), jnp.float32) * 0.1,
        "fc2_b": jax.random.normal(ks[4], (1,), jnp.float32) * 0.1,
        "w_v":   jax.random.normal(ks[5], (v_dim, 1), jnp.float32) * 0.01,
        "w_q":   jax.random.normal(ks[6], (q_dim, 1), jnp.float32) * 0.01,
    }

    V = jax.random.normal(ks[7], (B, v_seq_len, v_dim), jnp.float32)
    Q = jax.random.normal(ks[8], (B, his_max, q_dim), jnp.float32)
    time = jax.random.uniform(ks[9], (B, his_max), jnp.float32, 0.0, 10.0)
    usr_prof = jax.random.normal(ks[10], (B, hidden_size), jnp.float32)

    # block_b default 128; with B=32 the chooser picks TB=16 -> grid=(2,)
    # (even: keeps both v7x TensorCores busy; one extra cheap step on v5e/v6e).
    v_out, q_out = sl_attention(V, Q, time, usr_prof, params)
    jax.block_until_ready((v_out, q_out))

    v_ref, q_ref = sl_attention_reference(V, Q, time, usr_prof, params)
    assert jnp.allclose(v_out, v_ref, atol=1e-5, rtol=1e-4), "v mismatch"
    assert jnp.allclose(q_out, q_ref, atol=1e-5, rtol=1e-4), "q mismatch"

    print("KERNEL_OK")
</pallas_src>

<mosaic_0001>
module attributes {stable_mosaic.version = 11 : i64} {
  func.func @sl_attention_kernel(%arg0: i32, %arg1: memref<16x8x32xf32, #tpu.memory_space<vmem>>, %arg2: memref<16x8x32xf32, #tpu.memory_space<vmem>>, %arg3: memref<16x8x32xf32, #tpu.memory_space<vmem>>, %arg4: memref<16x16xf32, #tpu.memory_space<vmem>>, %arg5: memref<16x8x32xf32, #tpu.memory_space<vmem>>, %arg6: memref<16x8x32xf32, #tpu.memory_space<vmem>>) attributes {dimension_semantics = [#tpu.dimension_semantics<parallel>], iteration_bounds = array<i64: 2>, scalar_prefetch = 0 : i64, scratch_operands = 0 : i64, tpu.core_type = #tpu.core_type<tc>, window_params = [{transform_indices = @transform_0, window_bounds = array<i64: 16, 8, 32>}, {transform_indices = @transform_1, window_bounds = array<i64: 16, 8, 32>}, {transform_indices = @transform_2, window_bounds = array<i64: 16, 8, 32>}, {transform_indices = @transform_3, window_bounds = array<i64: 16, 16>}, {transform_indices = @transform_4, window_bounds = array<i64: 16, 8, 32>}, {transform_indices = @transform_5, window_bounds = array<i64: 16, 8, 32>}]} {
    %c0 = arith.constant 0 : index
    %c0_0 = arith.constant 0 : index
    %c0_1 = arith.constant 0 : index
    %0 = vector.load %arg1[%c0, %c0_0, %c0_1] : memref<16x8x32xf32, #tpu.memory_space<vmem>>, vector<16x8x32xf32>
    %c0_2 = arith.constant 0 : index
    %c0_3 = arith.constant 0 : index
    %c0_4 = arith.constant 0 : index
    %1 = vector.load %arg2[%c0_2, %c0_3, %c0_4] : memref<16x8x32xf32, #tpu.memory_space<vmem>>, vector<16x8x32xf32>
    %c0_5 = arith.constant 0 : index
    %c0_6 = arith.constant 0 : index
    %c0_7 = arith.constant 0 : index
    %2 = vector.load %arg3[%c0_5, %c0_6, %c0_7] : memref<16x8x32xf32, #tpu.memory_space<vmem>>, vector<16x8x32xf32>
    %c0_8 = arith.constant 0 : index
    %c0_9 = arith.constant 0 : index
    %3 = vector.load %arg4[%c0_8, %c0_9] : memref<16x16xf32, #tpu.memory_space<vmem>>, vector<16x16xf32>
    %4 = vector.extract_strided_slice %3 {offsets = [0, 0], sizes = [16, 8], strides = [1, 1]} : vector<16x16xf32> to vector<16x8xf32>
    %5 = vector.extract_strided_slice %3 {offsets = [0, 8], sizes = [16, 8], strides = [1, 1]} : vector<16x16xf32> to vector<16x8xf32>
    "tpu.trace_start"() <{level = 10 : i32, message = "tqd,tvd->tqv"}> : () -> ()
    %cst = arith.constant dense<0.000000e+00> : vector<16x8x8xf32>
    %6 = tpu.matmul %2, %0, %cst {dimension_numbers = #tpu.dot_dimension_numbers<[2], [2], [1], [1], [0, 0, 0, 1, 1, 1], [0], [0]>} : vector<16x8x32xf32>, vector<16x8x32xf32>, vector<16x8x8xf32> -> vector<16x8x8xf32>
    "tpu.trace_stop"() : () -> ()
    %7 = math.tanh %6 : vector<16x8x8xf32>
    %8 = vector.shape_cast %5 : vector<16x8xf32> to vector<16x8x1xf32>
    %9 = vector.broadcast %8 : vector<16x8x1xf32> to vector<16x8x8xf32>
    %10 = arith.mulf %9, %7 : vector<16x8x8xf32>
    %cst_10 = arith.constant dense<0.000000e+00> : vector<16x8xf32>
    %11 = vector.multi_reduction <add>, %10, %cst_10 [1] : vector<16x8x8xf32> to vector<16x8xf32>
    %cst_11 = arith.constant dense<0.000000e+00> : vector<16x8xf32>
    %12 = vector.multi_reduction <add>, %7, %cst_11 [2] : vector<16x8x8xf32> to vector<16x8xf32>
    %13 = vector.shape_cast %4 : vector<16x8xf32> to vector<16x8x1xf32>
    %14 = vector.shape_cast %11 : vector<16x8xf32> to vector<16x1x8xf32>
    %15 = vector.broadcast %13 : vector<16x8x1xf32> to vector<16x8x8xf32>
    %16 = vector.broadcast %14 : vector<16x1x8xf32> to vector<16x8x8xf32>
    %17 = arith.addf %15, %16 : vector<16x8x8xf32>
    %18 = math.tanh %17 : vector<16x8x8xf32>
    %19 = vector.shape_cast %5 : vector<16x8xf32> to vector<16x1x8xf32>
    %20 = vector.shape_cast %4 : vector<16x8xf32> to vector<16x8x1xf32>
    %21 = vector.shape_cast %12 : vector<16x8xf32> to vector<16x1x8xf32>
    %22 = vector.broadcast %20 : vector<16x8x1xf32> to vector<16x8x8xf32>
    %23 = vector.broadcast %21 : vector<16x1x8xf32> to vector<16x8x8xf32>
    %24 = arith.mulf %22, %23 : vector<16x8x8xf32>
    %25 = vector.broadcast %19 : vector<16x1x8xf32> to vector<16x8x8xf32>
    %26 = arith.addf %25, %24 : vector<16x8x8xf32>
    %27 = math.tanh %26 : vector<16x8x8xf32>
    %cst_12 = arith.constant dense<0xFF800000> : vector<16x8xf32>
    %28 = vector.multi_reduction <maximumf>, %18, %cst_12 [2] : vector<16x8x8xf32> to vector<16x8xf32>
    %cst_13 = arith.constant 0xFF800000 : f32
    %29 = vector.broadcast %cst_13 : f32 to vector<16x8xf32>
    %30 = arith.maximumf %29, %28 : vector<16x8xf32>
    %31 = vector.shape_cast %30 : vector<16x8xf32> to vector<16x8x1xf32>
    %32 = vector.broadcast %31 : vector<16x8x1xf32> to vector<16x8x8xf32>
    %33 = arith.subf %18, %32 : vector<16x8x8xf32>
    %34 = math.exp %33 : vector<16x8x8xf32>
    %cst_14 = arith.constant dense<0.000000e+00> : vector<16x8xf32>
    %35 = vector.multi_reduction <add>, %34, %cst_14 [2] : vector<16x8x8xf32> to vector<16x8xf32>
    %36 = vector.shape_cast %35 : vector<16x8xf32> to vector<16x8x1xf32>
    %37 = vector.broadcast %36 : vector<16x8x1xf32> to vector<16x8x8xf32>
    %38 = arith.divf %34, %37 : vector<16x8x8xf32>
    %cst_15 = arith.constant dense<0xFF800000> : vector<16x8xf32>
    %39 = vector.multi_reduction <maximumf>, %27, %cst_15 [2] : vector<16x8x8xf32> to vector<16x8xf32>
    %cst_16 = arith.constant 0xFF800000 : f32
    %40 = vector.broadcast %cst_16 : f32 to vector<16x8xf32>
    %41 = arith.maximumf %40, %39 : vector<16x8xf32>
    %42 = vector.shape_cast %41 : vector<16x8xf32> to vector<16x8x1xf32>
    %43 = vector.broadcast %42 : vector<16x8x1xf32> to vector<16x8x8xf32>
    %44 = arith.subf %27, %43 : vector<16x8x8xf32>
    %45 = math.exp %44 : vector<16x8x8xf32>
    %cst_17 = arith.constant dense<0.000000e+00> : vector<16x8xf32>
    %46 = vector.multi_reduction <add>, %45, %cst_17 [2] : vector<16x8x8xf32> to vector<16x8xf32>
    %47 = vector.shape_cast %46 : vector<16x8xf32> to vector<16x8x1xf32>
    %48 = vector.broadcast %47 : vector<16x8x1xf32> to vector<16x8x8xf32>
    %49 = arith.divf %45, %48 : vector<16x8x8xf32>
    "tpu.trace_start"() <{level = 10 : i32, message = "tij,tjd->tid"}> : () -> ()
    %cst_18 = arith.constant dense<0.000000e+00> : vector<16x8x32xf32>
    %50 = tpu.matmul %38, %0, %cst_18 {dimension_numbers = #tpu.dot_dimension_numbers<[2], [1], [1], [2], [0, 0, 0, 1, 1, 2], [0], [0]>} : vector<16x8x8xf32>, vector<16x8x32xf32>, vector<16x8x32xf32> -> vector<16x8x32xf32>
    "tpu.trace_stop"() : () -> ()
    %c0_19 = arith.constant 0 : index
    %c0_20 = arith.constant 0 : index
    %c0_21 = arith.constant 0 : index
    %51 = vector.load %arg5[%c0_19, %c0_20, %c0_21] : memref<16x8x32xf32, #tpu.memory_space<vmem>>, vector<16x8x32xf32>
    tpu.vector_store %arg5[%c0_19, %c0_20, %c0_21], %50 {strides = array<i32>} : memref<16x8x32xf32, #tpu.memory_space<vmem>>, vector<16x8x32xf32>,
    "tpu.trace_start"() <{level = 10 : i32, message = "tij,tjd->tid"}> : () -> ()
    %cst_22 = arith.constant dense<0.000000e+00> : vector<16x8x32xf32>
    %52 = tpu.matmul %49, %1, %cst_22 {dimension_numbers = #tpu.dot_dimension_numbers<[2], [1], [1], [2], [0, 0, 0, 1, 1, 2], [0], [0]>} : vector<16x8x8xf32>, vector<16x8x32xf32>, vector<16x8x32xf32> -> vector<16x8x32xf32>
    "tpu.trace_stop"() : () -> ()
    %c0_23 = arith.constant 0 : index
    %c0_24 = arith.constant 0 : index
    %c0_25 = arith.constant 0 : index
    %53 = vector.load %arg6[%c0_23, %c0_24, %c0_25] : memref<16x8x32xf32, #tpu.memory_space<vmem>>, vector<16x8x32xf32>
    tpu.vector_store %arg6[%c0_23, %c0_24, %c0_25], %52 {strides = array<i32>} : memref<16x8x32xf32, #tpu.memory_space<vmem>>, vector<16x8x32xf32>,
    return
  }
  func.func @transform_0(%arg0: i32) -> (i32, i32, i32) {
    %c0_i32 = arith.constant 0 : i32
    %c0_i32_0 = arith.constant 0 : i32
    %c0_i32_1 = arith.constant 0 : i32
    return %arg0, %c0_i32, %c0_i32_0 : i32, i32, i32
  }
  func.func @transform_1(%arg0: i32) -> (i32, i32, i32) {
    %c0_i32 = arith.constant 0 : i32
    %c0_i32_0 = arith.constant 0 : i32
    %c0_i32_1 = arith.constant 0 : i32
    return %arg0, %c0_i32, %c0_i32_0 : i32, i32, i32
  }
  func.func @transform_2(%arg0: i32) -> (i32, i32, i32) {
    %c0_i32 = arith.constant 0 : i32
    %c0_i32_0 = arith.constant 0 : i32
    %c0_i32_1 = arith.constant 0 : i32
    return %arg0, %c0_i32, %c0_i32_0 : i32, i32, i32
  }
  func.func @transform_3(%arg0: i32) -> (i32, i32) {
    %c0_i32 = arith.constant 0 : i32
    %c0_i32_0 = arith.constant 0 : i32
    return %arg0, %c0_i32 : i32, i32
  }
  func.func @transform_4(%arg0: i32) -> (i32, i32, i32) {
    %c0_i32 = arith.constant 0 : i32
    %c0_i32_0 = arith.constant 0 : i32
    %c0_i32_1 = arith.constant 0 : i32
    return %arg0, %c0_i32, %c0_i32_0 : i32, i32, i32
  }
  func.func @transform_5(%arg0: i32) -> (i32, i32, i32) {
    %c0_i32 = arith.constant 0 : i32
    %c0_i32_0 = arith.constant 0 : i32
    %c0_i32_1 = arith.constant 0 : i32
    return %arg0, %c0_i32, %c0_i32_0 : i32, i32, i32
  }
}

</mosaic_0001>

<bundles_post_ra>
// kernel: tpu_custom_call.1
= control target key start
LH: loop header
LB: loop body
LE: loop exit
PB: predicated region body
PF: predicated region fallthrough
CT: control target
= control target key end

     0   :  { %s5428_s0 = inlined_call_operand.hbm [shape: f32[32,8,32], index: 0, kind: input, shape index: {}]   ;;  %s5429_s1 = inlined_call_operand.hbm [shape: f32[32,8,32], index: 1, kind: input, shape index: {}]   ;;  %s5430_s2 = inlined_call_operand.hbm [shape: f32[32,8,32], index: 2, kind: input, shape index: {}]   ;;  %s5431_s3 = inlined_call_operand.vmem [shape: f32[32,16], index: 3, kind: input, shape index: {}]   ;;  %s5432_s4 = inlined_call_operand.hbm [shape: f32[32,8,32], index: 4, kind: output, shape index: {0}]   ;;  %s5433_s5 = inlined_call_operand.hbm [shape: f32[32,8,32], index: 5, kind: output, shape index: {1}]  }
   0x1   :  { %5440 = sst [smem:[#allocation18_spill]] %s5428_s0 }
   0x2   :  { %5441 = sst [smem:[#allocation19_spill]] %s5429_s1 }
   0x3   :  { %11 = vsyncpa [#allocation3], 0 }
   0x4   :  { %13 = vsyncpa [#allocation3 + $0x1], 0 }
   0x5   :  { %14 = vsyncpa [#allocation6], 0 }
   0x6   :  { %16 = vsyncpa [#allocation6 + $0x1], 0 }
   0x7   :  { %17 = vsyncpa [#allocation4], 0 }
   0x8   :  { %19 = vsyncpa [#allocation4 + $0x1], 0 }
   0x9   :  { %20 = vsyncpa [#allocation10], 0 }
   0xa   :  { %22 = vsyncpa [#allocation10 + $0x1], 0  ;;  %s4040_s18 = smov 0   ;;  %s4042_s19 = smov 0  }
   0xb   :  { %s4044_s20 = smov 0   ;;  %s4046_s21 = smov 0  }
   0xc LB: > { %5442 = sst [smem:[#allocation15_spill]] %s3999_s20  ;;  %s4061_s22 = sadd.s32 4294967295, %s4003_s21   ;;  %s4003_s21 = sphi %s4046_s21, %s5470_s21   ;;  %s3999_s20 = sphi %s4044_s20, %s5472_s20   ;;  %s3995_s19 = sphi %s4042_s19, %s5474_s19   ;;  %s3991_s18 = sphi %s4040_s18, %s5473_s18  }
   0xd   : > { %s3408_s23 = sadd.s32 4294967294, %s4003_s21   ;;  %s4065_s24 = sadd.s32 1, %s4003_s21  }
   0xe   : > { %5443 = sst [smem:[#allocation16_spill]] %s4065_s24  ;;  %s35_s25 = sadd.s32 1, %s3999_s20 }
   0xf   : > { %s32_s26 = ssub.s32 %s4003_s21, %s4065_s24  ;;  %p42_p0 = scmp.ne.s32.totalorder %s3999_s20, %s3995_s19 }
  0x10   : > { %p33_p1 = scmp.eq.s32.totalorder %s32_s26, 0  ;;  %p43_p2 = scmp.eq.s32.totalorder %s4003_s21, 0 }
  0x11   : > { %p48_p3 = scmp.ne.s32.totalorder %s3995_s19, %s3991_s18  ;;  %p49_p4 = scmp.eq.s32.totalorder %s4061_s22, 0 }
  0x12   : > { %s4077_s27 = scalar_select %p33_p1, %s3999_s20, %s35_s25  }
  0x13   : > { %p44_p5 = por %p43_p2, %p42_p0  ;;  %p4079_p6 = por %p49_p4, %p48_p3 }
  0x14   : > { %5444 = sst [smem:[#allocation17_spill]] %s4077_s27  ;;  %p150_p7 = scmp.eq.s32.totalorder %s4061_s22, 1 }
  0x15   : > { %p156_p8 = scmp.eq.s32.totalorder %s3408_s23, 1  ;;  %p3410_p9 = scmp.ge.s32.totalorder %s4003_s21, 2 }
  0x16   : > { %p3532_p10 = scmp.lt.s32.totalorder %s4003_s21, 2  ;;  %p4086_p11 = por %p150_p7, %p42_p0 }
  0x17   : > { %p4090_p12 = por %p156_p8, %p48_p3  ;;  %s5434_s6 = sand.u32 1, %s3999_s20  }
  0x18   : > { %s4096_s7 = sshll.u32 %s4003_s21, 7  ;;  %s4100_s8 = sshll.u32 %s5434_s6, 7 }
  0x19   : > { %p4102_p13 = pnand %p3532_p10, %p44_p5  ;;  %s224_s10 = sand.u32 1, %s4003_s21  }
  0x1a   : > { %s5449_s1 = sld [smem:[#allocation19_spill]]  ;;  %s228_s14 = scalar_lea.vmem [#allocation5], %s4100_s8 }
  0x1b   : > { %s236_s15 = sshll.u32 %s228_s14, 4  ;;  %p3420_p0 = scmp.ge.s32.totalorder %s4003_s21, 1  ;;  %s237_s15 = int_to_ptr.vmem [resolvable:$true] %s236_s15 }
  0x1c   : > { %s4113_s17 = scalar_lea.sflag [#allocation6], %s224_s10  ;;  %p3815_p2 = pneg %p4102_p13 }
  0x20   : > { %s233_s13 = scalar_lea.hbm %s5449_s1, %s4096_s7  ;;  %s3818_s12 = scalar_lea.hbm %s5449_s1, 256 }
  0x21   : > { %s234_s16 = sshll.u32 %s233_s13, 4  ;;  %s235_s16 = int_to_ptr.hbm [resolvable:$true] %s234_s16 }
  0x22   : > { %s3811_s23 = sshra.s32 %s235_s16, 4  ;;  %s3812_s23 = int_to_ptr.hbm [resolvable:$true] %s3811_s23 }
  0x23   : > { %s3813_s25 = scalar_lea.hbm %s3812_s23, 128  ;;  %p3819_p5 = scmp.lt.s32.totalorder %s3812_s23, %s5449_s1 }
  0x24   : > { %p3814_p1 = scmp.ne.s32.totalorder %s3812_s23, %s3813_s25  ;;  %p3820_p7 = scmp.lt.s32.totalorder %s3818_s12, %s3813_s25 }
  0x26   : > { %p3816_p3 = pnand %p3815_p2, %p3814_p1  ;;  %p3821_p8 = por %p3820_p7, %p3819_p5 }
  0x28   : > { %p3817_p4 = pneg %p3816_p3 }
  0x2a   : > { %p3822_p10 = pnand %p3821_p8, %p3817_p4 }
  0x2c   : > { %3825 = shalt.err (!%p3822_p10)
}
  0x2d   : > { %s5437_s10 = smov 128   ;;  %s4006_s6 = smov 8  }
  0x2e   : > { %3521 = dma.hbm_to_vmem [thread:$0]  (!%p4102_p13), %s235_s16, 2048, %s237_s15, %s4113_s17, %s5437_s10, %s5437_s10, %s4006_s6  }
  0x2f   : > { %p275_p1 = scmp.lt.s32.totalorder %s4003_s21, 3  ;;  %s5450_s0 = sld [smem:[#allocation18_spill]] }
  0x30   : > { %s206_s13 = scalar_lea.vmem [#allocation2], %s4100_s8  ;;  %s5452_s1 = sand.u32 1, %s3999_s20  }
  0x31   : > { %p4139_p3 = pnand %p3420_p0, %p275_p1  ;;  %s214_s14 = sshll.u32 %s206_s13, 4  ;;  %s215_s14 = int_to_ptr.vmem [resolvable:$true] %s214_s14 }
  0x32   : > { %s203_s27 = scalar_lea.sflag [#allocation3], %s5452_s1 }
  0x35   : > { %s211_s26 = scalar_lea.hbm %s5450_s0, %s4096_s7  ;;  %s3848_s25 = scalar_lea.hbm %s5450_s0, 256 }
  0x36   : > { %s212_s12 = sshll.u32 %s211_s26, 4  ;;  %s213_s12 = int_to_ptr.hbm [resolvable:$true] %s212_s12 }
  0x37   : > { %s3841_s24 = sshra.s32 %s213_s12, 4  ;;  %s3842_s24 = int_to_ptr.hbm [resolvable:$true] %s3841_s24 }
  0x38   : > { %s3843_s15 = scalar_lea.hbm %s3842_s24, 128  ;;  %p3849_p0 = scmp.lt.s32.totalorder %s3842_s24, %s5450_s0 }
  0x39   : > { %p3844_p4 = scmp.ne.s32.totalorder %s3842_s24, %s3843_s15  ;;  %p3850_p8 = scmp.lt.s32.totalorder %s3848_s25, %s3843_s15 }
  0x3b   : > { %p3846_p5 = pnand %p3844_p4, %p3815_p2  ;;  %p3851_p10 = por %p3850_p8, %p3849_p0 }
  0x3d   : > { %p3847_p7 = pneg %p3846_p5 }
  0x3f   : > { %p3852_p1 = pnand %p3851_p10, %p3847_p7 }
  0x41   : > { %3855 = shalt.err (!%p3852_p1)
}
  0x42   : > { %s5453_s1 = smov 128   ;;  %s255_s23 = scalar_lea.hbm %s5430_s2, %s4096_s7 }
  0x43   : > { %3518 = dma.hbm_to_vmem [thread:$0]  (!%p4102_p13), %s213_s12, 2048, %s215_s14, %s203_s27, %s5453_s1, %s5453_s1, %s4006_s6  }
  0x44   : > { %s250_s20 = scalar_lea.vmem [#allocation7], %s4100_s8  ;;  %s256_s24 = sshll.u32 %s255_s23, 4  ;;  %s257_s24 = int_to_ptr.hbm [resolvable:$true] %s256_s24 }
  0x45   : > { %s258_s10 = sshll.u32 %s250_s20, 4  ;;  %s3871_s15 = sshra.s32 %s257_s24, 4  ;;  %s259_s10 = int_to_ptr.vmem [resolvable:$true] %s258_s10  ;;  %s3872_s15 = int_to_ptr.hbm [resolvable:$true] %s3871_s15 }
  0x46   : > { %s3873_s25 = scalar_lea.hbm %s3872_s15, 128  ;;  %s3878_s27 = scalar_lea.hbm %s5430_s2, 256 }
  0x47   : > { %p3874_p4 = scmp.ne.s32.totalorder %s3872_s15, %s3873_s25  ;;  %p3879_p0 = scmp.lt.s32.totalorder %s3872_s15, %s5430_s2 }
  0x48   : > { %p3880_p8 = scmp.lt.s32.totalorder %s3878_s27, %s3873_s25 }
  0x49   : > { %p3876_p5 = pnand %p3874_p4, %p3815_p2 }
  0x4a   : > { %p3881_p10 = por %p3880_p8, %p3879_p0 }
  0x4b   : > { %p3877_p7 = pneg %p3876_p5 }
  0x4d   : > { %p3882_p1 = pnand %p3881_p10, %p3877_p7 }
  0x4f   : > { %3885 = shalt.err (!%p3882_p1)
}
  0x50   : > { %3524 = dma.hbm_to_vmem [thread:$0]  (!%p4102_p13), %s257_s24, 2048, %s259_s10, %s4113_s17, %s5453_s1, %s5453_s1, %s4006_s6  }
  0x51   : > { %279 = sbr.rel (%p4139_p3) target bundleno = 1238 (0x4d6), region = 36  ;;  %s4183_s0 = sand.u32 (!%p4139_p3), 1, %s3995_s19  }
  0x52   : > { %s4186_s20 = sshll.u32 (!%p4139_p3), %s4183_s0, 7  ;;  %s282_s7 = scalar_lea.sflag (!%p4139_p3), [#allocation3], %s4183_s0 }
  0x53   : > { %s4190_s8 = scalar_lea.vmem (!%p4139_p3), [#allocation2], %s4186_s20 }
  0x56   : > { %3974 = dma.done.wait (%p4079_p6), %s282_s7, 2048  }
  0x57   : > { %3976 = vsyncadd (%p4079_p6), %s282_s7, 4294965248  ;;  %s291_s6 = sand.u32 1, %s4061_s22   ;;  %s4198_s17 = scalar_lea.vmem [#allocation5], %s4186_s20 }
  0x58   : > { %s292_s9 = scalar_lea.sflag [#allocation6], %s291_s6 }
  0x59   : > { %3978 = dma.done.wait (%p4079_p6), %s292_s9, 4096  }
  0x5a   : > { %3980 = vsyncadd (%p4079_p6), %s292_s9, 4294963200  ;;  %v848_v0 = vlaneseq  ;;  %s3426_s11 = sshll.u32 %s4061_s22, 1  ;;  %vm414_vm0 = vcmask 261120   ;;  %v4210_v3 = vld [vmem:[%s4190_s8] sm:$0xff]  ;;  %v4213_v4 = vld [vmem:[%s4190_s8 + $0x8] sm:$0xff]  ;;  %s4231_s23 = scalar_lea.vmem [#allocation7], %s4186_s20 }
  0x5b   : > { %p357_p13 = scmp.lt.s32.totalorder %s3426_s11, 3  ;;  %v4216_v5 = vld [vmem:[%s4190_s8 + $0x10] sm:$0xff]  ;;  %3428 = vmatpush.xpose.msk.msra.mxu0 %vm414_vm0, %v4210_v3  ;;  %3430 = vmatpush.xpose.msk.msra.mxu1 %vm414_vm0, %v4213_v4  ;;  %v4228_v6 = vld [vmem:[%s4190_s8 + $0x18] sm:$0xff]  ;;  %v396_v7 = vld [vmem:[%s4231_s23] sm:$0xff]  ;;  %vm975_vm1 = vcmask 64512   ;;  %s4007_s10 = smov 8  }
  0x5c   : > { %v4206_v1 = vshrl.u32 %v848_v0, 7  ;;  %v397_v8 = vld [vmem:[%s4231_s23 + $0x8] sm:$0xff]  ;;  %3432 = vmatpush.xpose.msk.msra.mxu2 %vm414_vm0, %v4216_v5  ;;  %3434 = vmatpush.xpose.msk.msra.mxu3 %vm414_vm0, %v4228_v6  ;;  %v398_v9 = vld [vmem:[%s4231_s23 + $0x10] sm:$0xff]  ;;  %v399_v10 = vld [vmem:[%s4231_s23 + $0x18] sm:$0xff]  ;;  %vm1960_vm2 = vcmask 130112   ;;  %s4008_s24 = smov 120  }
  0x5d   : > { %s5476_s11 = smov (!%p357_p13, %s3426_s11), 3  ;;  %v4242_v11 = vld [vmem:[%s4190_s8 + $0x20] sm:$0xff]  ;;  %v4247_v12 = vld [vmem:[%s4190_s8 + $0x30] sm:$0xff]  ;;  %v4250_v13 = vld [vmem:[%s4190_s8 + $0x38] sm:$0xff]  ;;  %s4974_s15 = scalar_lea.vmem [#allocation8], %s4186_s20 }
  0x5e   : > { %v850_v2 = vadd.s32 8, %v4206_v1  ;;  %s3427_s1 = sshll.u32 %s5476_s11, 3  ;;  %3429 = vmatmul.msk.f32.vlgmr.msra.gmra.mxu0 %vm414_vm0, %v396_v7  ;;  %3431 = vmatmul.msk.f32.vlgmr.msra.gmra.mxu1 %vm414_vm0, %v397_v8  ;;  %v4265_v18 = vld [vmem:[%s4190_s8 + $0x28] sm:$0xff]  ;;  %v374_v19 = vld [vmem:[%s4190_s8 + $0x50] sm:$0xff]  ;;  %v372_v20 = vld [vmem:[%s4190_s8 + $0x40] sm:$0xff]  ;;  %s3503_s25 = sshll.u32 %s4061_s22, 7 }
  0x5f   : > { %s4221_s16 = scalar_lea.vmem %s5431_s3, %s3427_s1  ;;  %3436 = vmatpush.xpose.msk.msrb.mxu0 %vm414_vm0, %v4242_v11  ;;  %3433 = vmatmul.msk.f32.vlgmr.msra.gmra.mxu2 %vm414_vm0, %v398_v9  ;;  %v373_v21 = vld [vmem:[%s4190_s8 + $0x48] sm:$0xff]  ;;  %v375_v22 = vld [vmem:[%s4190_s8 + $0x58] sm:$0xff]  ;;  %v400_v23 = vld [vmem:[%s4231_s23 + $0x20] sm:$0xff]  ;;  %s3226_s12 = scalar_lea.hbm %s5432_s4, %s3503_s25 }
  0x60   : > { %3573 = vset.pattern.permute.xlu2 %v850_v2  ;;  %3572 = vset.pattern.permute.xlu1 %v850_v2  ;;  %v4253_v14 = vld [vmem:[%s4221_s16] sm:$0xff]  ;;  %v401_v24 = vld [vmem:[%s4231_s23 + $0x28] sm:$0xff]  ;;  %v402_v25 = vld [vmem:[%s4231_s23 + $0x30] sm:$0xff]  ;;  %s3227_s14 = sshll.u32 %s4974_s15, 4  ;;  %s3229_s7 = sshll.u32 %s3226_s12, 4  ;;  %s3228_s14 = int_to_ptr.vmem [resolvable:$true] %s3227_s14  ;;  %s3230_s7 = int_to_ptr.hbm [resolvable:$true] %s3229_s7 }
  0x61   : > { %3571 = vset.pattern.permute.xlu0 %v850_v2  ;;  %v875_v15 = vperm.slane %v4253_v14, 4  ;;  %v861_v16 = vperm.slane %v4253_v14, 2  ;;  %v4260_v17 = vperm.slane %v4253_v14, 0  ;;  %3435 = vmatmul.msk.f32.vlgmr.msra.gmra.mxu3 %vm414_vm0, %v399_v10  ;;  %v403_v26 = vld [vmem:[%s4231_s23 + $0x38] sm:$0xff]  ;;  %v882_v27 = vperm.slane %v4253_v14, 5  ;;  %v377_v29 = vld [vmem:[%s4190_s8 + $0x68] sm:$0xff] }
  0x62   : > { %3440 = vmatpush.xpose.msk.msrb.mxu2 %vm414_vm0, %v4247_v12  ;;  %3442 = vmatpush.xpose.msk.msrb.mxu3 %vm414_vm0, %v4250_v13  ;;  %v868_v28 = vperm.slane %v4253_v14, 3  ;;  %v378_v30 = vld [vmem:[%s4190_s8 + $0x70] sm:$0xff]  ;;  %v854_v31 = vperm.slane %v4253_v14, 1  ;;  %v376_v32 = vld [vmem:[%s4190_s8 + $0x60] sm:$0xff]  ;;  %v379_v33 = vld [vmem:[%s4190_s8 + $0x78] sm:$0xff]  ;;  %v896_v40 = vperm.slane %v4253_v14, 7 }
  0x63   : > { %3438 = vmatpush.xpose.msk.msrb.mxu1 %vm414_vm0, %v4265_v18  ;;  %3444 = vmatpush.xpose.msk.msra.mxu0 %vm414_vm0, %v372_v20  ;;  %v4308_v34 = vld [vmem:[%s4221_s16 + $0x8] sm:$0xff]  ;;  %v404_v35 = vld [vmem:[%s4231_s23 + $0x40] sm:$0xff]  ;;  %v406_v37 = vld [vmem:[%s4231_s23 + $0x50] sm:$0xff]  ;;  %v889_v41 = vperm.slane %v4253_v14, 6  ;;  %s3915_s6 = sshra.s32 %s3230_s7, 4  ;;  %s3921_s1 = scalar_lea.hbm %s5432_s4, 256  ;;  %s3916_s6 = int_to_ptr.hbm [resolvable:$true] %s3915_s6 }
  0x64   : > { %v405_v36 = vld [vmem:[%s4231_s23 + $0x48] sm:$0xff]  ;;  %v407_v38 = vld [vmem:[%s4231_s23 + $0x58] sm:$0xff]  ;;  %v4317_v39 = vperm.slane %v4308_v34, 0  ;;  %v408_v43 = vld [vmem:[%s4231_s23 + $0x60] sm:$0xff]  ;;  %v924_v46 = vperm.slane %v4308_v34, 3  ;;  %v917_v47 = vperm.slane %v4308_v34, 2  ;;  %p3922_p4 = scmp.lt.s32.totalorder %s3916_s6, %s5432_s4 }
  0x65   : > { %v409_v42 = vld [vmem:[%s4231_s23 + $0x68] sm:$0xff]  ;;  %v410_v44 = vld [vmem:[%s4231_s23 + $0x70] sm:$0xff]  ;;  %v411_v45 = vld [vmem:[%s4231_s23 + $0x78] sm:$0xff]  ;;  %v910_v48 = vperm.slane %v4308_v34, 1  ;;  %v945_v49 = vperm.slane %v4308_v34, 6  ;;  %v938_v50 = vperm.slane %v4308_v34, 5 }
  0x66   : > { %3448 = vmatpush.xpose.msk.msra.mxu2 %vm414_vm0, %v374_v19  ;;  %3450 = vmatpush.xpose.msk.msra.mxu3 %vm414_vm0, %v375_v22  ;;  %v931_v51 = vperm.slane %v4308_v34, 4  ;;  %v952_v52 = vperm.slane %v4308_v34, 7  ;;  %s3917_s9 = scalar_lea.hbm %s3916_s6, 128 }
  0x67   : > { %3446 = vmatpush.xpose.msk.msra.mxu1 %vm414_vm0, %v373_v21  ;;  %3437 = vmatmul.msk.f32.vlgmr.msrb.gmra.mxu0 %vm414_vm0, %v400_v23  ;;  %p3918_p6 = scmp.ne.s32.totalorder %s3916_s6, %s3917_s9  ;;  %p3923_p5 = scmp.lt.s32.totalorder %s3921_s1, %s3917_s9 }
  0x68   : > { %880 = vperm.xlu2 %3573, %v875_v15   ;;  %866 = vperm.xlu1 %3572, %v861_v16  }
  0x69   : > { %852 = vperm.xlu0 %3571, %v4260_v17   ;;  %3439 = vmatmul.msk.f32.vlgmr.msrb.gmra.mxu1 %vm414_vm0, %v401_v24  ;;  %p3919_p2 = pnand %p3918_p6, %p4086_p11  ;;  %p3924_p7 = por %p3923_p5, %p3922_p4 }
  0x6a   : > { %3441 = vmatmul.msk.f32.vlgmr.msrb.gmra.mxu2 %vm414_vm0, %v402_v25  ;;  %3443 = vmatmul.msk.f32.vlgmr.msrb.gmra.mxu3 %vm414_vm0, %v403_v26 }
  0x6b   : > { %3454 = vmatpush.xpose.msk.msrb.mxu1 %vm414_vm0, %v377_v29  ;;  %3456 = vmatpush.xpose.msk.msrb.mxu2 %vm414_vm0, %v378_v30  ;;  %p3920_p3 = pneg %p3919_p2 }
  0x6c   : > { %3452 = vmatpush.xpose.msk.msrb.mxu0 %vm414_vm0, %v376_v32  ;;  %3458 = vmatpush.xpose.msk.msrb.mxu3 %vm414_vm0, %v379_v33 }
  0x6d   : > { %p3925_p0 = pnand %p3924_p7, %p3920_p3 }
  0x6f   : > { %3445 = vmatmul.msk.f32.vlgmr.msra.gmra.mxu0 %vm414_vm0, %v404_v35 }
  0x70   : > { %887 = vperm.xlu2 %3573, %v882_v27   ;;  %873 = vperm.xlu1 %3572, %v868_v28  }
  0x71   : > { %859 = vperm.xlu0 %3571, %v854_v31   ;;  %3447 = vmatmul.msk.f32.vlgmr.msra.gmra.mxu1 %vm414_vm0, %v405_v36 }
  0x72   : > { %3449 = vmatmul.msk.f32.vlgmr.msra.gmra.mxu2 %vm414_vm0, %v406_v37  ;;  %3451 = vmatmul.msk.f32.vlgmr.msra.gmra.mxu3 %vm414_vm0, %v407_v38 }
  0x73   : > { %2496 = vmatpush.msra.mxu3 %v4228_v6  ;;  %2427 = vmatpush.msra.mxu0 %v4210_v3 }
  0x74   : > { %2473 = vmatpush.msra.mxu2 %v4216_v5  ;;  %2450 = vmatpush.msra.mxu1 %v4213_v4 }
  0x77   : > { %3453 = vmatmul.msk.f32.vlgmr.msrb.gmra.mxu0 %vm414_vm0, %v408_v43 }
  0x78   : > { %908 = vperm.xlu2 %3573, %v4317_v39   ;;  %901 = vperm.xlu1 %3572, %v896_v40  }
  0x79   : > { %894 = vperm.xlu0 %3571, %v889_v41   ;;  %3455 = vmatmul.msk.f32.vlgmr.msrb.gmra.mxu1 %vm414_vm0, %v409_v42 }
  0x7a   : > { %3457 = vmatmul.msk.f32.vlgmr.msrb.gmra.mxu2 %vm414_vm0, %v410_v44  ;;  %3459 = vmatmul.msk.f32.vlgmr.msrb.gmra.mxu3 %vm414_vm0, %v411_v45 }
  0x7b   : > { %2588 = vmatpush.msrb.mxu3 %v4250_v13  ;;  %2565 = vmatpush.msrb.mxu2 %v4247_v12 }
  0x7c   : > { %2542 = vmatpush.msrb.mxu1 %v4265_v18  ;;  %2519 = vmatpush.msrb.mxu0 %v4242_v11 }
  0x80   : > { %929 = vperm.xlu2 %3573, %v924_v46   ;;  %922 = vperm.xlu1 %3572, %v917_v47  }
  0x81   : > { %915 = vperm.xlu0 %3571, %v910_v48  }
  0x88   : > { %950 = vperm.xlu2 %3573, %v945_v49   ;;  %943 = vperm.xlu1 %3572, %v938_v50  }
  0x89   : > { %936 = vperm.xlu0 %3571, %v931_v51  }
  0x90   : > { %3575 = vset.pattern.permute.xlu2 %v4206_v1  ;;  %3574 = vset.pattern.permute.xlu1 %v4206_v1 }
  0x91   : > { %957 = vperm.xlu0 %3571, %v952_v52  }
  0x98   : > { %1146 = vperm.xlu2 %3575, %v854_v31   ;;  %1140 = vperm.xlu1 %3574, %v4260_v17  }
  0x99   : > { %3576 = vset.pattern.permute.xlu0 %v4206_v1 }
  0xa0   : > { %1164 = vperm.xlu2 %3575, %v875_v15   ;;  %1158 = vperm.xlu1 %3574, %v868_v28  }
  0xa1   : > { %1152 = vperm.xlu0 %3576, %v861_v16  }
  0xa8   : > { %1176 = vperm.xlu2 %3575, %v889_v41   ;;  %1170 = vperm.xlu1 %3574, %v882_v27  }
  0xa9   : > { %1206 = vperm.xlu0 %3576, %v924_v46  }
  0xb0   : > { %1200 = vperm.xlu2 %3575, %v917_v47   ;;  %1182 = vperm.xlu1 %3574, %v896_v40  }
  0xb1   : > { %1224 = vperm.xlu0 %3576, %v945_v49  }
  0xb8   : > { %1194 = vperm.xlu2 %3575, %v910_v48   ;;  %1188 = vperm.xlu1 %3574, %v4317_v39  }
  0xc2   : > { %v881_v30 = vpop.permute.xlu2 %880 }
  0xca   : > { %v4429_v46 = vpop.permute.xlu2 %887 }
  0xda   : > { %v4368_v53 = vpop.permute.xlu1 %866 }
  0xdb   : > { %v4370_v54 = vpop.permute.xlu0 %852  ;;  %v438_v55 = vpop.f32.mrf.mxu0 }
  0xdc   : > { %3577 = vtanh.f32 %v438_v55  ;;  %v464_v56 = vpop.f32.mrf.mxu1 }
  0xdd   : > { %3579 = vtanh.f32 %v464_v56 }
  0xe2   : > { %v4372_v57 = vpop.permute.xlu1 %873  ;;  %v4376_v59 = vpop.eup %3577 }
  0xe3   : > { %v4374_v58 = vpop.permute.xlu0 %859  ;;  %v490_v60 = vpop.f32.mrf.mxu2  ;;  %v1088_v1 = vsel %vm975_vm1, %v4376_v59, 0.0 }
  0xe4   : > { %v516_v61 = vpop.f32.mrf.mxu3  ;;  %v4378_v62 = vpop.eup %3579  ;;  %3581 = vtanh.f32 %v490_v60  ;;  %1089 = vadd.xlane.f32.xlu1 %v1088_v1 }
  0xe5   : > { %v542_v63 = vpop.f32.mrf.mxu0  ;;  %3583 = vtanh.f32 %v516_v61  ;;  %v1091_v3 = vsel %vm975_vm1, %v4378_v62, 0.0 }
  0xe6   : > { %v568_v2 = vpop.f32.mrf.mxu1  ;;  %3585 = vtanh.f32 %v542_v63  ;;  %1092 = vadd.xlane.f32.xlu2 %v1091_v3  ;;  %v4442_v3 = vpop.permute.xlu2 %908 }
  0xe7   : > { %3587 = vtanh.f32 %v568_v2 }
  0xea   : > { %v4386_v5 = vpop.permute.xlu1 %901  ;;  %v4388_v6 = vpop.eup %3581 }
  0xeb   : > { %v4384_v4 = vpop.permute.xlu0 %894  ;;  %v4390_v7 = vpop.eup %3583  ;;  %v1094_v10 = vsel %vm975_vm1, %v4388_v6, 0.0 }
  0xec   : > { %v4394_v11 = vpop.eup %3585  ;;  %1095 = vadd.xlane.f32.xlu0 %v1094_v10  ;;  %v1097_v12 = vsel %vm975_vm1, %v4390_v7, 0.0  ;;  %v962_v10 = vmul.f32 %v4390_v7, %v4372_v57 }
  0xed   : > { %v594_v8 = vpop.f32.mrf.mxu2  ;;  %v620_v9 = vpop.f32.mrf.mxu3  ;;  %v1100_v16 = vsel %vm975_vm1, %v4394_v11, 0.0 }
  0xee   : > { %3589 = vtanh.f32 %v594_v8  ;;  %v646_v13 = vpop.f32.mrf.mxu0  ;;  %v672_v15 = vpop.f32.mrf.mxu1  ;;  %1098 = vadd.xlane.f32.xlu2 %v1097_v12  ;;  %1101 = vadd.xlane.f32.xlu1 %v1100_v16  ;;  %v961_v12 = vmul.f32 %v4388_v6, %v4368_v53  ;;  %v997_v16 = vsel %vm975_vm1, %v962_v10, 0.0  ;;  %v959_v53 = vmul.f32 %v4376_v59, %v4370_v54 }
  0xef   : > { %3591 = vtanh.f32 %v620_v9  ;;  %v4402_v19 = vpop.eup %3587  ;;  %v930_v9 = vpop.permute.xlu2 %929  ;;  %v998_v57 = vrot.slane %v997_v16, 4  ;;  %v960_v54 = vmul.f32 %v4378_v62, %v4374_v58 }
  0xf0   : > { %3593 = vtanh.f32 %v672_v15  ;;  %v1103_v25 = vsel %vm975_vm1, %v4402_v19, 0.0  ;;  %v963_v15 = vmul.f32 %v4394_v11, %v881_v30 }
  0xf1   : > { %3595 = vtanh.f32 %v646_v13 }
  0xf2   : > { %v4406_v21 = vpop.permute.xlu1 %922  ;;  %v1004_v6 = vsel %vm975_vm1, %v963_v15, 0.0 }
  0xf3   : > { %v4400_v18 = vpop.permute.xlu0 %915  ;;  %v1005_v11 = vrot.slane %v1004_v6, 4 }
  0xf4   : > { %v4404_v20 = vpop.eup %3589 }
  0xf5   : > { %v698_v22 = vpop.f32.mrf.mxu2  ;;  %v724_v23 = vpop.f32.mrf.mxu3  ;;  %v1106_v24 = vsel %vm975_vm1, %v4404_v20, 0.0  ;;  %v965_v62 = vmul.f32 %v4404_v20, %v4384_v4 }
  0xf6   : > { %v4412_v26 = vpop.eup %3591  ;;  %3597 = vtanh.f32 %v698_v22  ;;  %1107 = vadd.xlane.f32.xlu0 %v1106_v24  ;;  %v776_v27 = vpop.f32.mrf.mxu1  ;;  %1104 = vadd.xlane.f32.xlu2 %v1103_v25  ;;  %v999_v24 = vadd.f32 %v998_v57, %v997_v16  ;;  %v976_v25 = vsel %vm975_vm1, %v959_v53, 0.0 }
  0xf7   : > { %v1109_v28 = vsel %vm975_vm1, %v4412_v26, 0.0  ;;  %v750_v29 = vpop.f32.mrf.mxu0  ;;  %3599 = vtanh.f32 %v776_v27  ;;  %v4416_v31 = vpop.eup %3593  ;;  %v977_v30 = vrot.slane %v976_v25, 4  ;;  %v1018_v10 = vsel %vm975_vm1, %v965_v62, 0.0 }
  0xf8   : > { %1110 = vadd.xlane.f32.xlu1 %v1109_v28  ;;  %3601 = vtanh.f32 %v750_v29  ;;  %v4418_v32 = vpop.eup %3595  ;;  %v1115_v33 = vsel %vm975_vm1, %v4416_v31, 0.0  ;;  %v4450_v13 = vpop.permute.xlu2 %950  ;;  %v1006_v29 = vadd.f32 %v1005_v11, %v1004_v6  ;;  %v1019_v6 = vrot.slane %v1018_v10, 4 }
  0xf9   : > { %v1112_v38 = vsel %vm975_vm1, %v4418_v32, 0.0  ;;  %3603 = vtanh.f32 %v724_v23  ;;  %v990_v23 = vsel %vm975_vm1, %v961_v12, 0.0 }
  0xfa   : > { %v944_v42 = vpop.permute.xlu1 %943  ;;  %v991_v7 = vrot.slane %v990_v23, 4 }
  0xfb   : > { %v937_v35 = vpop.permute.xlu0 %936 }
  0xfc   : > { %v3598_v36 = vpop.eup %3597  ;;  %v992_v27 = vadd.f32 %v991_v7, %v990_v23 }
  0xfd   : > { %v1118_v37 = vsel %vm975_vm1, %v3598_v36, 0.0  ;;  %v828_v40 = vpop.f32.mrf.mxu3  ;;  %v3600_v41 = vpop.eup %3599  ;;  %v969_v59 = vmul.f32 %v3598_v36, %v4406_v21 }
  0xfe   : > { %1116 = vadd.xlane.f32.xlu0 %v1115_v33  ;;  %3605 = vtanh.f32 %v828_v40  ;;  %v3602_v43 = vpop.eup %3601  ;;  %v4425_v44 = vmul.f32 %v3600_v41, %v944_v42  ;;  %1113 = vadd.xlane.f32.xlu2 %v1112_v38  ;;  %v802_v47 = vpop.f32.mrf.mxu2  ;;  %v1127_v60 = vsel %vm975_vm1, %v3600_v41, 0.0  ;;  %v1000_v33 = vrot.slane %v999_v24, 2 }
  0xff   : > { %v4427_v45 = vmul.f32 %v3602_v43, %v937_v35  ;;  %v1124_v48 = vsel %vm975_vm1, %v3602_v43, 0.0  ;;  %v4432_v49 = vpop.eup %3603  ;;  %3607 = vtanh.f32 %v802_v47  ;;  %v983_v35 = vsel %vm975_vm1, %v960_v54, 0.0 }
 0x100   : > { %1119 = vadd.xlane.f32.xlu1 %v1118_v37  ;;  %v1121_v61 = vsel %vm975_vm1, %v4432_v49, 0.0  ;;  %v1007_v37 = vrot.slane %v1006_v29, 2  ;;  %v1046_v38 = vsel %vm975_vm1, %v969_v59, 0.0  ;;  %v978_v40 = vadd.f32 %v977_v30, %v976_v25 }
 0x101   : > { %v1001_v41 = vadd.f32 %v1000_v33, %v999_v24  ;;  %v984_v47 = vrot.slane %v983_v35, 4  ;;  %v1047_v21 = vrot.slane %v1046_v38, 4 }
 0x102   : > { %v1008_v36 = vadd.f32 %v1007_v37, %v1006_v29  ;;  %v1020_v29 = vadd.f32 %v1019_v6, %v1018_v10 }
 0x103   : > { %v958_v56 = vpop.permute.xlu0 %957  ;;  %v1048_v12 = vadd.f32 %v1047_v21, %v1046_v38 }
 0x104   : > { %v3606_v55 = vpop.eup %3605  ;;  %v1009_v15 = vrot.slane %v1008_v36, 1 }
 0x105   : > { %v4437_v63 = vmul.f32 %v3606_v55, %v958_v56  ;;  %v1133_v1 = vsel %vm975_vm1, %v3606_v55, 0.0  ;;  %v4440_v2 = vpop.eup %3607  ;;  %v1002_v55 = vrot.slane %v1001_v41, 1  ;;  %v1049_v11 = vrot.slane %v1048_v12, 2 }
 0x106   : > { %1125 = vadd.xlane.f32.xlu0 %v1124_v48  ;;  %1122 = vadd.xlane.f32.xlu2 %v1121_v61  ;;  %v1130_v8 = vsel %vm975_vm1, %v4440_v2, 0.0  ;;  %v979_v48 = vrot.slane %v978_v40, 2  ;;  %v985_v61 = vadd.f32 %v984_v47, %v983_v35 }
 0x107   : > { %v1003_v23 = vadd.f32 %v1002_v55, %v1001_v41  ;;  %v1050_v30 = vadd.f32 %v1049_v11, %v1048_v12  ;;  %v1021_v41 = vrot.slane %v1020_v29, 2 }
 0x108   : > { %1128 = vadd.xlane.f32.xlu1 %v1127_v60  ;;  %v980_v16 = vadd.f32 %v979_v48, %v978_v40  ;;  %v986_v53 = vrot.slane %v985_v61, 2 }
 0x109   : > { %v1022_v48 = vadd.f32 %v1021_v41, %v1020_v29 }
 0x10a   : > { %v4458_v22 = vpop.permute.xlu1 %1140  ;;  %v981_v25 = vrot.slane %v980_v16, 1  ;;  %v987_v59 = vadd.f32 %v986_v53, %v985_v61 }
 0x10c   : > { %v988_v40 = vrot.slane %v987_v59, 1 }
 0x10e   : > { %1134 = vadd.xlane.f32.xlu0 %v1133_v1  ;;  %1131 = vadd.xlane.f32.xlu2 %v1130_v8  ;;  %v970_v1 = vmul.f32 %v4432_v49, %v930_v9  ;;  %v1010_v9 = vadd.f32 %v1009_v15, %v1008_v36  ;;  %v989_v36 = vadd.f32 %v988_v40, %v987_v59 }
 0x113   : > { %v4487_v57 = vpop.permute.xlu0 %1152 }
 0x11b   : > { %v4522_v11 = vpop.permute.xlu0 %1206 }
 0x121   : > { %1230 = vperm.xlu1 %3574, %v952_v52   ;;  %v4468_v52 = vpop.permute.xlu2 %1146 }
 0x122   : > { %1218 = vperm.xlu0 %3576, %v938_v50   ;;  %v966_v50 = vmul.f32 %v4412_v26, %v4386_v5  ;;  %v993_v5 = vrot.slane %v992_v27, 2  ;;  %v1233_v15 = vadd.f32 %v4468_v52, %v989_v36 }
 0x124   : > { %v1025_v28 = vsel %vm975_vm1, %v966_v50, 0.0  ;;  %v994_v42 = vadd.f32 %v993_v5, %v992_v27  ;;  %v1053_v50 = vsel %vm975_vm1, %v970_v1, 0.0  ;;  %v964_v27 = vmul.f32 %v4402_v19, %v4429_v46 }
 0x125   : > { %v1026_v26 = vrot.slane %v1025_v28, 4  ;;  %v982_v5 = vadd.f32 %v981_v25, %v980_v16  ;;  %v1051_v46 = vrot.slane %v1050_v30, 1  ;;  %v1023_v16 = vrot.slane %v1022_v48, 1 }
 0x126   : > { %1212 = vperm.xlu2 %3575, %v931_v51   ;;  %v4475_v51 = vpop.permute.xlu1 %1158  ;;  %v995_v56 = vrot.slane %v994_v42, 1  ;;  %v1011_v35 = vsel %vm975_vm1, %v964_v27, 0.0 }
 0x127   : > { %v1027_v43 = vadd.f32 %v1026_v26, %v1025_v28  ;;  %v1235_v7 = vadd.f32 %v4475_v51, %v1003_v23  ;;  %v1054_v28 = vrot.slane %v1053_v50, 4  ;;  %v1232_v19 = vadd.f32 %v4458_v22, %v982_v5 }
 0x128   : > { %v996_v4 = vadd.f32 %v995_v56, %v994_v42  ;;  %v1012_v47 = vrot.slane %v1011_v35, 4  ;;  %v1052_v56 = vadd.f32 %v1051_v46, %v1050_v30 }
 0x129   : > { %v4479_v58 = vpop.permute.xlu2 %1164  ;;  %v1028_v60 = vrot.slane %v1027_v43, 2  ;;  %3609 = vtanh.f32 %v1235_v7  ;;  %v1055_v37 = vadd.f32 %v1054_v28, %v1053_v50  ;;  %v1024_v50 = vadd.f32 %v1023_v16, %v1022_v48 }
 0x12a   : > { %v1234_v49 = vadd.f32 %v4487_v57, %v996_v4  ;;  %v1236_v33 = vadd.f32 %v4479_v58, %v1010_v9  ;;  %v1013_v61 = vadd.f32 %v1012_v47, %v1011_v35 }
 0x12b   : > { %v1029_v20 = vadd.f32 %v1028_v60, %v1027_v43  ;;  %v1056_v21 = vrot.slane %v1055_v37, 2 }
 0x12c   : > { %3611 = vtanh.f32 %v1234_v49 }
 0x12d   : > { %v1030_v54 = vrot.slane %v1029_v20, 1  ;;  %3613 = vtanh.f32 %v1236_v33  ;;  %v1057_v10 = vadd.f32 %v1056_v21, %v1055_v37  ;;  %v4537_v33 = vand.u32 127, %v848_v0 }
 0x12e   : > { %v4484_v8 = vpop.permute.xlu1 %1170  ;;  %3615 = vtanh.f32 %v1232_v19 }
 0x12f   : > { %v1031_v38 = vadd.f32 %v1030_v54, %v1029_v20  ;;  %v4502_v43 = vpop.eup %3609  ;;  %v1014_v20 = vrot.slane %v1013_v61, 2  ;;  %v1058_v6 = vrot.slane %v1057_v10, 1 }
 0x130   : > { %v1585_v60 = vsel %vm975_vm1, %v4502_v43, -inf }
 0x131   : > { %v4492_v24 = vpop.permute.xlu2 %1176  ;;  %v1015_v27 = vadd.f32 %v1014_v20, %v1013_v61  ;;  %v1059_v54 = vadd.f32 %v1058_v6, %v1057_v10 }
 0x132   : > { %v4504_v62 = vpop.eup %3611  ;;  %v1238_v59 = vadd.f32 %v4492_v24, %v1024_v50 }
 0x133   : > { %v1582_v1 = vsel %vm975_vm1, %v4504_v62, -inf  ;;  %v4512_v12 = vpop.eup %3613  ;;  %v1243_v29 = vadd.f32 %v4522_v11, %v1059_v54  ;;  %v1016_v5 = vrot.slane %v1015_v27, 1 }
 0x134   : > { %v4516_v4 = vpop.eup %3615  ;;  %v1588_v7 = vsel %vm975_vm1, %v4512_v12, -inf }
 0x135   : > { %v1576_v9 = vsel %vm975_vm1, %v4516_v4, -inf  ;;  %v1017_v40 = vadd.f32 %v1016_v5, %v1015_v27 }
 0x136   : > { %v4497_v26 = vpop.permute.xlu1 %1182 }
 0x137   : > { %v1239_v42 = vadd.f32 %v4497_v26, %v1031_v38  ;;  %v1237_v0 = vadd.f32 %v4484_v8, %v1017_v40 }
 0x139   : > { %v4506_v55 = vpop.permute.xlu2 %1200  ;;  %3617 = vtanh.f32 %v1239_v42  ;;  %v4546_v42 = vpop.permute.xlu0 %1224 }
 0x13a   : > { %v1242_v23 = vadd.f32 %v4506_v55, %v1052_v56  ;;  %3619 = vtanh.f32 %v1233_v15 }
 0x13c   : > { %3621 = vtanh.f32 %v1242_v23 }
 0x13d   : > { %3623 = vtanh.f32 %v1238_v59 }
 0x13e   : > { %v4524_v49 = vpop.permute.xlu1 %1188  ;;  %3625 = vtanh.f32 %v1243_v29 }
 0x13f   : > { %v4518_v53 = vpop.eup %3617  ;;  %3627 = vtanh.f32 %v1237_v0 }
 0x140   : > { %v1597_v28 = vsel %vm975_vm1, %v4518_v53, -inf  ;;  %v4534_v30 = vpop.eup %3619 }
 0x141   : > { %v4528_v25 = vpop.permute.xlu2 %1194  ;;  %v1579_v38 = vsel %vm975_vm1, %v4534_v30, -inf }
 0x142   : > { %v4539_v35 = vpop.eup %3621 }
 0x143   : > { %v1606_v46 = vsel %vm975_vm1, %v4539_v35, -inf  ;;  %v4550_v21 = vpop.eup %3623 }
 0x144   : > { %v4552_v36 = vpop.eup %3625  ;;  %v1594_v48 = vsel %vm975_vm1, %v4550_v21, -inf }
 0x145   : > { %v1609_v61 = vsel %vm975_vm1, %v4552_v36, -inf  ;;  %v4562_v15 = vpop.eup %3627 }
 0x146   : > { %v1591_v16 = vsel %vm975_vm1, %v4562_v15, -inf }
 0x14b   : > { %1586 = vmax.xlane.f32.xlu1 %v1585_v60 }
 0x14c   : > { %1583 = vmax.xlane.f32.xlu0 %v1582_v1 }
 0x14f   : > { %1589 = vmax.xlane.f32.xlu2 %v1588_v7 }
 0x153   : > { %1577 = vmax.xlane.f32.xlu1 %v1576_v9 }
 0x154   : > { %1598 = vmax.xlane.f32.xlu0 %v1597_v28 }
 0x157   : > { %v1090_v37 = vpop.xlane.xlu1 %1089 }
 0x158   : > { %v1298_v19 = vperm.slane %v1090_v37, %v4537_v33 }
 0x159   : > { %v1093_v41 = vpop.xlane.xlu2 %1092 }
 0x15a   : > { %v1432_v47 = vmul.f32 %v1298_v19, %v4458_v22 }
 0x15b   : > { %1580 = vmax.xlane.f32.xlu1 %v1579_v38 }
 0x15c   : > { %1607 = vmax.xlane.f32.xlu0 %v1606_v46  ;;  %v1067_v46 = vsel %vm975_vm1, %v4425_v44, 0.0 }
 0x15f   : > { %v1096_v1 = vpop.xlane.xlu0 %1095 }
 0x161   : > { %v1099_v56 = vpop.xlane.xlu2 %1098  ;;  %v4556_v60 = vpop.xlane.xlu1 %1101 }
 0x162   : > { %v1301_v10 = vperm.slane %v1099_v56, %v4537_v33  ;;  %v1068_v56 = vrot.slane %v1067_v46, 4 }
 0x163   : > { %1595 = vmax.xlane.f32.xlu1 %v1594_v48 }
 0x164   : > { %1610 = vmax.xlane.f32.xlu0 %v1609_v61  ;;  %v1435_v22 = vmul.f32 %v1301_v10, %v4475_v51  ;;  %v1060_v51 = vsel %vm975_vm1, %v4427_v45, 0.0 }
 0x165   : > { %v1061_v59 = vrot.slane %v1060_v51, 4 }
 0x167   : > { %1502 = vrot.lane.b32.xlu2 %v1435_v22, %s4007_s10 }
 0x169   : > { %v1105_v23 = vpop.xlane.xlu2 %1104  ;;  %v1108_v7 = vpop.xlane.xlu0 %1107 }
 0x16a   : > { %v1303_v6 = vperm.slane %v1105_v23, %v4537_v33  ;;  %v1304_v9 = vperm.slane %v1108_v7, %v4537_v33  ;;  %v1069_v23 = vadd.f32 %v1068_v56, %v1067_v46  ;;  %v1081_v56 = vsel %vm975_vm1, %v4437_v63, 0.0 }
 0x16b   : > { %1592 = vmax.xlane.f32.xlu1 %v1591_v16  ;;  %v1111_v20 = vpop.xlane.xlu1 %1110 }
 0x16c   : > { %v1437_v50 = vmul.f32 %v1303_v6, %v4484_v8  ;;  %v1438_v5 = vmul.f32 %v1304_v9, %v4492_v24  ;;  %v1062_v8 = vadd.f32 %v1061_v59, %v1060_v51  ;;  %v1305_v38 = vperm.slane %v1111_v20, %v4537_v33 }
 0x16d   : > { %v1070_v20 = vrot.slane %v1069_v23, 2 }
 0x16e   : > { %v1063_v0 = vrot.slane %v1062_v8, 2  ;;  %v1439_v24 = vmul.f32 %v1305_v38, %v4497_v26  ;;  %v1300_v26 = vperm.slane %v1096_v1, %v4537_v33  ;;  %v1302_v1 = vperm.slane %v4556_v60, %v4537_v33 }
 0x16f   : > { %1506 = vrot.lane.b32.xlu2 %v1437_v50, %s4007_s10  ;;  %v1071_v9 = vadd.f32 %v1070_v20, %v1069_v23  ;;  %v973_v23 = vmul.f32 %v4440_v2, %v4450_v13 }
 0x170   : > { %v1064_v10 = vadd.f32 %v1063_v0, %v1062_v8  ;;  %v1434_v6 = vmul.f32 %v1300_v26, %v4487_v57  ;;  %v1436_v59 = vmul.f32 %v1302_v1, %v4479_v58  ;;  %v968_v8 = vmul.f32 %v4416_v31, %v4400_v18 }
 0x171   : > { %v1114_v28 = vpop.xlane.xlu2 %1113  ;;  %v1117_v37 = vpop.xlane.xlu0 %1116  ;;  %v1074_v20 = vsel %vm975_vm1, %v973_v23, 0.0 }
 0x172   : > { %v1306_v45 = vperm.slane %v1114_v28, %v4537_v33  ;;  %v1307_v44 = vperm.slane %v1117_v37, %v4537_v33  ;;  %v1072_v28 = vrot.slane %v1071_v9, 1  ;;  %v1039_v58 = vsel %vm975_vm1, %v968_v8, 0.0 }
 0x173   : > { %v1120_v27 = vpop.xlane.xlu1 %1119  ;;  %v1268_v8 = vrot.slane %v4253_v14, 3 }
 0x174   : > { %v1308_v54 = vperm.slane %v1120_v27, %v4537_v33  ;;  %v1440_v48 = vmul.f32 %v1306_v45, %v4524_v49  ;;  %v1073_v37 = vadd.f32 %v1072_v28, %v1071_v9 }
 0x176   : > { %v1442_v29 = vmul.f32 %v1308_v54, %v4506_v55  ;;  %v1299_v55 = vperm.slane %v1093_v41, %v4537_v33  ;;  %v1065_v41 = vrot.slane %v1064_v10, 1 }
 0x177   : > { %1508 = vrot.lane.b32.xlu2 %v1438_v5, %s4007_s10 }
 0x178   : > { %1496 = vrot.lane.b32.xlu0 %v1432_v47, %s4007_s10  ;;  %v1433_v22 = vmul.f32 %v1299_v55, %v4468_v52  ;;  %v1066_v7 = vadd.f32 %v1065_v41, %v1064_v10 }
 0x179   : > { %v1123_v40 = vpop.xlane.xlu2 %1122  ;;  %v1126_v61 = vpop.xlane.xlu0 %1125 }
 0x17a   : > { %v1309_v19 = vperm.slane %v1123_v40, %v4537_v33  ;;  %v1310_v57 = vperm.slane %v1126_v61, %v4537_v33 }
 0x17b   : > { %v1129_v51 = vpop.xlane.xlu1 %1128 }
 0x17c   : > { %v1443_v47 = vmul.f32 %v1309_v19, %v4522_v11  ;;  %v1441_v11 = vmul.f32 %v1307_v44, %v4528_v25  ;;  %v1040_v19 = vrot.slane %v1039_v58, 4  ;;  %v1311_v0 = vperm.slane %v1129_v51, %v4537_v33 }
 0x17e   : > { %v1041_v31 = vadd.f32 %v1040_v19, %v1039_v58  ;;  %v1451_v58 = vperm.slane %v1268_v8, 0 }
 0x17f   : > { %1512 = vrot.lane.b32.xlu2 %v1440_v48, %s4007_s10 }
 0x180   : > { %1510 = vrot.lane.b32.xlu0 %v1439_v24, %s4007_s10  ;;  %v1042_v48 = vrot.slane %v1041_v31, 2 }
 0x181   : > { %v1132_v16 = vpop.xlane.xlu2 %1131  ;;  %v1135_v50 = vpop.xlane.xlu0 %1134 }
 0x182   : > { %v1313_v54 = vperm.slane %v1135_v50, %v4537_v33  ;;  %v1312_v61 = vperm.slane %v1132_v16, %v4537_v33  ;;  %v1043_v10 = vadd.f32 %v1042_v48, %v1041_v31  ;;  %v1075_v33 = vrot.slane %v1074_v20, 4 }
 0x184   : > { %1498 = vrot.lane.b32.xlu1 %v1433_v22, %s4007_s10  ;;  %v1044_v26 = vrot.slane %v1043_v10, 1  ;;  %v1076_v51 = vadd.f32 %v1075_v33, %v1074_v20  ;;  %v1279_v33 = vrot.slane %v4308_v34, 7 }
 0x186   : > { %v1045_v63 = vadd.f32 %v1044_v26, %v1043_v10  ;;  %v1077_v2 = vrot.slane %v1076_v51, 2 }
 0x188   : > { %1514 = vrot.lane.b32.xlu0 %v1441_v11, %s4007_s10 }
 0x189   : > { %v1213_v52 = vpop.permute.xlu2 %1212 }
 0x18a   : > { %v4596_v27 = vadd.f32 %v1213_v52, %v1066_v7  ;;  %v1444_v60 = vmul.f32 %v1310_v57, %v1213_v52 }
 0x18c   : > { %1500 = vrot.lane.b32.xlu1 %v1434_v6, %s4007_s10  ;;  %v1241_v6 = vadd.f32 %v4528_v25, %v1045_v63 }
 0x18e   : > { %3629 = vtanh.f32 %v1241_v6 }
 0x190   : > { %1516 = vrot.lane.b32.xlu0 %v1442_v29, %s4007_s10  ;;  %v967_v29 = vmul.f32 %v4418_v32, %v4442_v3  ;;  %v1082_v32 = vrot.slane %v1081_v56, 4 }
 0x192   : > { %v1032_v46 = vsel %vm975_vm1, %v967_v29, 0.0  ;;  %v1083_v22 = vadd.f32 %v1082_v32, %v1081_v56 }
 0x193   : > { %v1231_v5 = vpop.permute.xlu1 %1230  ;;  %v1033_v18 = vrot.slane %v1032_v46, 4 }
 0x194   : > { %v1447_v38 = vmul.f32 %v1313_v54, %v1231_v5  ;;  %1504 = vrot.lane.b32.xlu1 %v1436_v59, %s4007_s10  ;;  %v1219_v45 = vpop.permute.xlu0 %1218  ;;  %v1084_v11 = vrot.slane %v1083_v22, 2  ;;  %v4629_v9 = vpop.eup %3629  ;;  %v1078_v54 = vadd.f32 %v1077_v2, %v1076_v51  ;;  %v3801_v51 = vld [vmem:[%s4221_s16] sm:$0xff] }
 0x195   : > { %v4608_v40 = vadd.f32 %v1219_v45, %v1073_v37  ;;  %v1034_v55 = vadd.f32 %v1033_v18, %v1032_v46  ;;  %v1445_v24 = vmul.f32 %v1311_v0, %v1219_v45  ;;  %v1603_v25 = vsel %vm975_vm1, %v4629_v9, -inf }
 0x196   : > { %1526 = vrot.lane.b32.xlu2 %v1447_v38, %s4007_s10  ;;  %v1085_v7 = vadd.f32 %v1084_v11, %v1083_v22  ;;  %v1079_v59 = vrot.slane %v1078_v54, 1  ;;  %v1270_v18 = vrot.slane %v4253_v14, 5 }
 0x197   : > { %v1035_v3 = vrot.slane %v1034_v55, 2 }
 0x198   : > { %1520 = vrot.lane.b32.xlu0 %v1444_v60, %s4007_s10  ;;  %v1086_v52 = vrot.slane %v1085_v7, 1  ;;  %v1080_v38 = vadd.f32 %v1079_v59, %v1078_v54 }
 0x199   : > { %v1036_v44 = vadd.f32 %v1035_v3, %v1034_v55  ;;  %v1453_v55 = vperm.slane %v1270_v18, 0  ;;  %v1271_v3 = vrot.slane %v4253_v14, 6 }
 0x19a   : > { %v1087_v13 = vadd.f32 %v1086_v52, %v1085_v7  ;;  %v1246_v60 = vadd.f32 %v4546_v42, %v1080_v38  ;;  %v1272_v52 = vrot.slane %v3801_v51, 7 }
 0x19b   : > { %v1037_v41 = vrot.slane %v1036_v44, 1  ;;  %v1454_v22 = vperm.slane %v1271_v3, 0 }
 0x19c   : > { %1518 = vrot.lane.b32.xlu1 %v1443_v47, %s4007_s10  ;;  %v1446_v47 = vmul.f32 %v1312_v61, %v4546_v42  ;;  %v1247_v1 = vadd.f32 %v1231_v5, %v1087_v13  ;;  %v1463_v13 = vperm.slane %v1279_v33, 0  ;;  %v1455_v54 = vperm.slane %v1272_v52, 0 }
 0x19d   : > { %v1038_v16 = vadd.f32 %v1037_v41, %v1036_v44  ;;  %v1269_v33 = vrot.slane %v3801_v51, 4 }
 0x19f   : > { %v1240_v50 = vadd.f32 %v4524_v49, %v1038_v16 }
 0x1a1   : > { %3631 = vtanh.f32 %v1240_v50 }
 0x1a2   : > { %3633 = vtanh.f32 %v1247_v1 }
 0x1a3   : > { %3635 = vtanh.f32 %v1246_v60 }
 0x1a4   : > { %1522 = vrot.lane.b32.xlu1 %v1445_v24, %s4007_s10 }
 0x1a7   : > { %v4631_v28 = vpop.eup %3631 }
 0x1a8   : > { %v1600_v49 = vsel %vm975_vm1, %v4631_v28, -inf  ;;  %v4642_v5 = vpop.eup %3633 }
 0x1a9   : > { %v1621_v29 = vsel %vm975_vm1, %v4642_v5, -inf  ;;  %v4654_v24 = vpop.eup %3635 }
 0x1aa   : > { %v1618_v32 = vsel %vm975_vm1, %v4654_v24, -inf }
 0x1ac   : > { %1524 = vrot.lane.b32.xlu1 %v1446_v47, %s4007_s10 }
 0x1be   : > { %v4644_v45 = vpop.xlane.xlu1 %1586 }
 0x1bf   : > { %1604 = vmax.xlane.f32.xlu2 %v1603_v25  ;;  %v4637_v57 = vpop.xlane.xlu0 %1583  ;;  %v1266_v25 = vrot.slane %v3801_v51, 1 }
 0x1c1   : > { %v1449_v60 = vperm.slane %v1266_v25, 0 }
 0x1c2   : > { %1601 = vmax.xlane.f32.xlu0 %v1600_v49  ;;  %v4639_v37 = vpop.xlane.xlu2 %1589 }
 0x1c6   : > { %v4652_v0 = vpop.xlane.xlu1 %1577 }
 0x1c7   : > { %v4650_v31 = vpop.xlane.xlu0 %1598 }
 0x1ca   : > { %1622 = vmax.xlane.f32.xlu0 %v1621_v29  ;;  %v1503_v19 = vpop.permute.xlu2 %1502  ;;  %v1273_v29 = vrot.slane %v4308_v34, 1 }
 0x1cb   : > { %v1547_v46 = vadd.f32 %v1503_v19, %v1451_v58 }
 0x1cc   : > { %v1457_v18 = vperm.slane %v1273_v29, 0 }
 0x1cd   : > { %3637 = vtanh.f32 %v1547_v46 }
 0x1ce   : > { %v4665_v44 = vpop.xlane.xlu1 %1580 }
 0x1cf   : > { %v4663_v10 = vpop.xlane.xlu0 %1607 }
 0x1d2   : > { %v1507_v42 = vpop.permute.xlu2 %1506 }
 0x1d3   : > { %v4656_v48 = vpop.eup %3637  ;;  %v1549_v56 = vadd.f32 %v1507_v42, %v1453_v55  ;;  %v1267_v55 = vrot.slane %v3801_v51, 2  ;;  %v1627_v42 = vsub.f32 %v4502_v43, %v4644_v45 }
 0x1d4   : > { %v1970_v61 = vsel %vm1960_vm2, %v4656_v48, -inf }
 0x1d5   : > { %3639 = vtanh.f32 %v1549_v56  ;;  %1971 = vmax.xlane.f32.xlu0 %v1970_v61 }
 0x1d6   : > { %1619 = vmax.xlane.f32.xlu1 %v1618_v32  ;;  %v4673_v41 = vpop.xlane.xlu1 %1595 }
 0x1d7   : > { %v4671_v14 = vpop.xlane.xlu0 %1610 }
 0x1da   : > { %v1509_v47 = vpop.permute.xlu2 %1508 }
 0x1db   : > { %v4667_v23 = vpop.eup %3639  ;;  %v1550_v26 = vadd.f32 %v1509_v47, %v1454_v22  ;;  %v1450_v22 = vperm.slane %v1267_v55, 0  ;;  %v4704_v47 = vld [vmem:[%s4221_s16 + $0x8] sm:$0xff]  ;;  %v1624_v55 = vsub.f32 %v4516_v4, %v4652_v0 }
 0x1dc   : > { %v1976_v11 = vsel %vm1960_vm2, %v4667_v23, -inf  ;;  %v1276_v25 = vrot.slane %v4704_v47, 4  ;;  %v1275_v29 = vrot.slane %v4704_v47, 3 }
 0x1dd   : > { %3641 = vtanh.f32 %v1550_v26  ;;  %1977 = vmax.xlane.f32.xlu0 %v1976_v11  ;;  %v1274_v26 = vrot.slane %v4704_v47, 2 }
 0x1de   : > { %v4685_v1 = vpop.xlane.xlu1 %1592 }
 0x1e2   : > { %v1513_v63 = vpop.permute.xlu2 %1512 }
 0x1e3   : > { %v4675_v20 = vpop.eup %3641  ;;  %v1552_v6 = vadd.f32 %v1513_v63, %v4317_v39 }
 0x1e4   : > { %v1979_v7 = vsel %vm1960_vm2, %v4675_v20, -inf }
 0x1e5   : > { %3643 = vtanh.f32 %v1552_v6  ;;  %1980 = vmax.xlane.f32.xlu0 %v1979_v7  ;;  %v1458_v7 = vperm.slane %v1274_v26, 0  ;;  %v1640_v26 = vmul.f32 1.442695, %v1624_v55  ;;  %v1625_v55 = vsub.f32 %v4534_v30, %v4665_v44 }
 0x1ea   : > { %v1497_v16 = vpop.permute.xlu0 %1496 }
 0x1eb   : > { %v1544_v50 = vadd.f32 %v1497_v16, %v4260_v17  ;;  %v4683_v2 = vpop.eup %3643 }
 0x1ec   : > { %v1985_v39 = vsel %vm1960_vm2, %v4683_v2, -inf }
 0x1ed   : > { %3645 = vtanh.f32 %v1544_v50  ;;  %1986 = vmax.xlane.f32.xlu0 %v1985_v39 }
 0x1f0   : > { %v1527_v49 = vpop.permute.xlu2 %1526 }
 0x1f1   : > { %v1559_v59 = vadd.f32 %v1527_v49, %v1463_v13 }
 0x1f2   : > { %v1511_v8 = vpop.permute.xlu0 %1510 }
 0x1f3   : > { %v4689_v38 = vpop.eup %3645  ;;  %3647 = vtanh.f32 %v1559_v59  ;;  %v1551_v17 = vadd.f32 %v1511_v8, %v1455_v54  ;;  %v1452_v54 = vperm.slane %v1269_v33, 0 }
 0x1f4   : > { %v1961_v58 = vsel %vm1960_vm2, %v4689_v38, -inf }
 0x1f5   : > { %3649 = vtanh.f32 %v1551_v17  ;;  %1962 = vmax.xlane.f32.xlu1 %v1961_v58 }
 0x1f6   : > { %v1499_v19 = vpop.permute.xlu1 %1498  ;;  %3651 = vtanh.f32 %v4608_v40  ;;  %v1646_v40 = vmul.f32 1.442695, %v1627_v42 }
 0x1f7   : > { %v1545_v46 = vadd.f32 %v1499_v19, %v1449_v60  ;;  %v1460_v60 = vperm.slane %v1276_v25, 0 }
 0x1f9   : > { %v4697_v56 = vpop.eup %3647  ;;  %3653 = vtanh.f32 %v1545_v46 }
 0x1fa   : > { %v1515_v32 = vpop.permute.xlu0 %1514  ;;  %v2006_v34 = vsel %vm1960_vm2, %v4697_v56, -inf }
 0x1fb   : > { %v4701_v3 = vpop.eup %3649  ;;  %v1553_v61 = vadd.f32 %v1515_v32, %v1457_v18  ;;  %2007 = vmax.xlane.f32.xlu0 %v2006_v34  ;;  %v1459_v32 = vperm.slane %v1275_v29, 0  ;;  %v1626_v29 = vsub.f32 %v4504_v62, %v4637_v57 }
 0x1fc   : > { %v1982_v43 = vsel %vm1960_vm2, %v4701_v3, -inf  ;;  %v4709_v45 = vpop.eup %3651 }
 0x1fd   : > { %3655 = vtanh.f32 %v1553_v61  ;;  %1983 = vmax.xlane.f32.xlu1 %v1982_v43  ;;  %v1615_v52 = vsel %vm975_vm1, %v4709_v45, -inf  ;;  %v1277_v43 = vrot.slane %v4704_v47, 5 }
 0x1fe   : > { %v1501_v11 = vpop.permute.xlu1 %1500  ;;  %3657 = vpow2.f32 %v1646_v40 }
 0x1ff   : > { %v4711_v63 = vpop.eup %3653  ;;  %v1546_v6 = vadd.f32 %v1501_v11, %v1450_v22  ;;  %v1461_v0 = vperm.slane %v1277_v43, 0 }
 0x200   : > { %v1964_v16 = vsel %vm1960_vm2, %v4711_v63, -inf }
 0x201   : > { %3659 = vtanh.f32 %v1546_v6  ;;  %1965 = vmax.xlane.f32.xlu2 %v1964_v16 }
 0x202   : > { %v1517_v50 = vpop.permute.xlu0 %1516 }
 0x203   : > { %v4717_v13 = vpop.eup %3655  ;;  %v1554_v39 = vadd.f32 %v1517_v50, %v1458_v7  ;;  %1616 = vmax.xlane.f32.xlu0 %v1615_v52  ;;  %v1278_v50 = vrot.slane %v4704_v47, 6 }
 0x204   : > { %v1988_v51 = vsel %vm1960_vm2, %v4717_v13, -inf  ;;  %v4722_v49 = vpop.eup %3657 }
 0x205   : > { %3661 = vtanh.f32 %v1554_v39  ;;  %1989 = vmax.xlane.f32.xlu1 %v1988_v51  ;;  %v1681_v46 = vsel %vm975_vm1, %v4722_v49, 0.0 }
 0x206   : > { %v1505_v59 = vpop.permute.xlu1 %1504 }
 0x207   : > { %v4724_v8 = vpop.eup %3659  ;;  %v1548_v17 = vadd.f32 %v1505_v59, %v1452_v54  ;;  %v1462_v54 = vperm.slane %v1278_v50, 0 }
 0x208   : > { %v1967_v58 = vsel %vm1960_vm2, %v4724_v8, -inf }
 0x209   : > { %3663 = vtanh.f32 %v1548_v17  ;;  %1968 = vmax.xlane.f32.xlu2 %v1967_v58 }
 0x20a   : > { %v1521_v19 = vpop.permute.xlu0 %1520 }
 0x20b   : > { %v4731_v18 = vpop.eup %3661  ;;  %v1556_v42 = vadd.f32 %v1521_v19, %v1460_v60  ;;  %1682 = vadd.xlane.f32.xlu0 %v1681_v46  ;;  %v1644_v19 = vmul.f32 1.442695, %v1626_v29 }
 0x20c   : > { %v1991_v34 = vsel %vm1960_vm2, %v4731_v18, -inf }
 0x20d   : > { %3665 = vtanh.f32 %v1556_v42  ;;  %1992 = vmax.xlane.f32.xlu1 %v1991_v34 }
 0x20e   : > { %v1519_v61 = vpop.permute.xlu1 %1518 }
 0x20f   : > { %v4737_v22 = vpop.eup %3663  ;;  %v1555_v40 = vadd.f32 %v1519_v61, %v1459_v32  ;;  %v1642_v32 = vmul.f32 1.442695, %v1625_v55 }
 0x210   : > { %v1973_v11 = vsel %vm1960_vm2, %v4737_v22, -inf }
 0x211   : > { %3667 = vtanh.f32 %v1555_v40  ;;  %1974 = vmax.xlane.f32.xlu2 %v1973_v11 }
 0x212   : > { %3669 = vpow2.f32 %v1640_v26 }
 0x213   : > { %v4742_v4 = vpop.eup %3665 }
 0x214   : > { %v1997_v6 = vsel %vm1960_vm2, %v4742_v4, -inf }
 0x215   : > { %1998 = vmax.xlane.f32.xlu1 %v1997_v6 }
 0x216   : > { %v1523_v7 = vpop.permute.xlu1 %1522 }
 0x217   : > { %v4746_v33 = vpop.eup %3667  ;;  %v1557_v16 = vadd.f32 %v1523_v7, %v1461_v0 }
 0x218   : > { %v1994_v52 = vsel %vm1960_vm2, %v4746_v33, -inf  ;;  %v4751_v39 = vpop.eup %3669 }
 0x219   : > { %3671 = vtanh.f32 %v1557_v16  ;;  %1995 = vmax.xlane.f32.xlu2 %v1994_v52  ;;  %v1672_v25 = vsel %vm975_vm1, %v4751_v39, 0.0 }
 0x21d   : > { %1673 = vadd.xlane.f32.xlu1 %v1672_v25 }
 0x21e   : > { %v1525_v51 = vpop.permute.xlu1 %1524 }
 0x21f   : > { %v4755_v59 = vpop.eup %3671  ;;  %v1558_v17 = vadd.f32 %v1525_v51, %v1462_v54 }
 0x220   : > { %v2000_v60 = vsel %vm1960_vm2, %v4755_v59, -inf }
 0x221   : > { %3673 = vtanh.f32 %v1558_v17  ;;  %2001 = vmax.xlane.f32.xlu2 %v2000_v60 }
 0x222   : > { %3675 = vtanh.f32 %v4596_v27 }
 0x223   : > { %3677 = vpow2.f32 %v1644_v19 }
 0x224   : > { %3679 = vpow2.f32 %v1642_v32 }
 0x227   : > { %v4759_v47 = vpop.eup %3673 }
 0x228   : > { %v2003_v58 = vsel %vm1960_vm2, %v4759_v47, -inf  ;;  %v4766_v46 = vpop.eup %3675 }
 0x229   : > { %2004 = vmax.xlane.f32.xlu2 %v2003_v58  ;;  %v1612_v42 = vsel %vm975_vm1, %v4766_v46, -inf  ;;  %v4772_v27 = vpop.eup %3677 }
 0x22a   : > { %v1678_v57 = vsel %vm975_vm1, %v4772_v27, 0.0  ;;  %v4778_v34 = vpop.eup %3679 }
 0x22b   : > { %v1675_v61 = vsel %vm975_vm1, %v4778_v34, 0.0 }
 0x231   : > { %1613 = vmax.xlane.f32.xlu2 %v1612_v42 }
 0x232   : > { %v4794_v54 = vpop.xlane.xlu2 %1604 }
 0x235   : > { %v4774_v62 = vpop.xlane.xlu0 %1601 }
 0x239   : > { %1679 = vadd.xlane.f32.xlu2 %v1678_v57 }
 0x23d   : > { %v4782_v30 = vpop.xlane.xlu0 %1622 }
 0x241   : > { %1676 = vadd.xlane.f32.xlu2 %v1675_v61 }
 0x248   : > { %v1972_v44 = vpop.xlane.xlu0 %1971 }
 0x249   : > { %v2012_v26 = vsub.f32 %v4656_v48, %v1972_v44  ;;  %v4789_v6 = vpop.xlane.xlu1 %1619 }
 0x24b   : > { %v2031_v40 = vmul.f32 1.442695, %v2012_v26 }
 0x24d   : > { %3681 = vpow2.f32 %v2031_v40 }
 0x250   : > { %v1978_v43 = vpop.xlane.xlu0 %1977 }
 0x251   : > { %v2014_v61 = vsub.f32 %v4667_v23, %v1978_v43 }
 0x253   : > { %v4785_v11 = vpop.eup %3681  ;;  %v2035_v40 = vmul.f32 1.442695, %v2014_v61 }
 0x254   : > { %2079 = vrot.lane.b32.xlu0 %v4785_v11, %s4008_s24 }
 0x258   : > { %v1981_v0 = vpop.xlane.xlu0 %1980 }
 0x260   : > { %v4791_v7 = vpop.xlane.xlu0 %1986 }
 0x268   : > { %v1963_v16 = vpop.xlane.xlu1 %1962 }
 0x269   : > { %v2009_v50 = vsub.f32 %v4689_v38, %v1963_v16 }
 0x26b   : > { %v2025_v52 = vmul.f32 1.442695, %v2009_v50 }
 0x26d   : > { %3683 = vpow2.f32 %v2025_v52 }
 0x26e   : > { %v4796_v48 = vpop.xlane.xlu0 %2007 }
 0x270   : > { %v4798_v25 = vpop.xlane.xlu1 %1983 }
 0x273   : > { %v4800_v51 = vpop.eup %3683 }
 0x274   : > { %v1966_v17 = vpop.xlane.xlu2 %1965  ;;  %2073 = vrot.lane.b32.xlu2 %v4800_v51, %s4008_s24 }
 0x275   : > { %v2010_v60 = vsub.f32 %v4711_v63, %v1966_v17 }
 0x276   : > { %v4805_v29 = vpop.xlane.xlu0 %1616 }
 0x277   : > { %v2027_v58 = vmul.f32 1.442695, %v2010_v60 }
 0x278   : > { %v4807_v38 = vpop.xlane.xlu1 %1989 }
 0x279   : > { %3685 = vpow2.f32 %v2027_v58  ;;  %v2015_v58 = vsub.f32 %v4675_v20, %v1981_v0 }
 0x27c   : > { %v1969_v19 = vpop.xlane.xlu2 %1968 }
 0x27d   : > { %v2011_v55 = vsub.f32 %v4724_v8, %v1969_v19 }
 0x27e   : > { %v1683_v42 = vpop.xlane.xlu0 %1682 }
 0x27f   : > { %v4810_v32 = vpop.eup %3685  ;;  %v2029_v57 = vmul.f32 1.442695, %v2011_v55  ;;  %3687 = vrcp.f32 %v1683_v42  ;;  %vm1770_vm4 = vweird.f32 %v1683_v42 }
 0x280   : > { %v1993_v44 = vpop.xlane.xlu1 %1992  ;;  %2075 = vrot.lane.b32.xlu1 %v4810_v32, %s4008_s24 }
 0x281   : > { %3689 = vpow2.f32 %v2029_v57  ;;  %v2019_v63 = vsub.f32 %v4731_v18, %v1993_v44  ;;  %v1776_v18 = vand.u32 2147483648, %v1683_v42  ;;  %v1774_v57 = vand.u32 2147483647, %v1683_v42 }
 0x283   : > { %v2045_v26 = vmul.f32 1.442695, %v2019_v63  ;;  %v1777_v20 = vor.u32 1.1754944e-38, %v1776_v18  ;;  %vm1775_vm6 = vcmp.eq.f32.partialorder %v1774_v57, 8.507059e+37 }
 0x284   : > { %v1975_v16 = vpop.xlane.xlu2 %1974 }
 0x285   : > { %v3688_v50 = vpop.eup %3687  ;;  %3691 = vpow2.f32 %v2045_v26  ;;  %v2013_v8 = vsub.f32 %v4737_v22, %v1975_v16  ;;  %v2037_v26 = vmul.f32 1.442695, %v2015_v58 }
 0x286   : > { %v1766_v52 = vmul.f32 %v3688_v50, %v1683_v42  ;;  %3693 = vpow2.f32 %v2035_v40  ;;  %vm1771_vm3 = vweird.f32 %v3688_v50  ;;  %v2016_v42 = vsub.f32 %v4701_v3, %v4798_v25 }
 0x287   : > { %v4817_v17 = vpop.eup %3689  ;;  %v2033_v60 = vmul.f32 1.442695, %v2013_v8  ;;  %vm1772_vm5 = vmor %vm1770_vm4, %vm1771_vm3 }
 0x288   : > { %v1767_v23 = vsub.f32 1.0, %v1766_v52  ;;  %v1999_v43 = vpop.xlane.xlu1 %1998  ;;  %2077 = vrot.lane.b32.xlu2 %v4817_v17, %s4008_s24 }
 0x289   : > { %3695 = vpow2.f32 %v2033_v60  ;;  %v2021_v19 = vsub.f32 %v4742_v4, %v1999_v43  ;;  %v3803_v60 = vld [vmem:[%s4190_s8 + $0x58] sm:$0xff] }
 0x28a   : > { %v1768_v55 = vmul.f32 %v3688_v50, %v1767_v23  ;;  %v2039_v23 = vmul.f32 1.442695, %v2016_v42 }
 0x28b   : > { %v4823_v22 = vpop.eup %3691  ;;  %v2049_v61 = vmul.f32 1.442695, %v2021_v19 }
 0x28c   : > { %v1769_v44 = vadd.f32 %v3688_v50, %v1768_v55  ;;  %v4825_v63 = vpop.xlane.xlu2 %1995  ;;  %2093 = vrot.lane.b32.xlu1 %v4823_v22, %s4008_s24  ;;  %v4829_v0 = vpop.eup %3693 }
 0x28d   : > { %3697 = vpow2.f32 %v2049_v61 }
 0x28e   : > { %v1773_v4 = vsel %vm1772_vm5, %v3688_v50, %v1769_v44  ;;  %3699 = vpow2.f32 %v2037_v26 }
 0x28f   : > { %v4831_v40 = vpop.eup %3695  ;;  %v1778_v16 = vsel %vm1775_vm6, %v1777_v20, %v1773_v4 }
 0x290   : > { %v1674_v8 = vpop.xlane.xlu1 %1673  ;;  %2081 = vrot.lane.b32.xlu0 %v4831_v40, %s4008_s24  ;;  %2083 = vrot.lane.b32.xlu2 %v4829_v0, %s4008_s24  ;;  %v1779_v52 = vmul.f32 %v4722_v49, %v1778_v16  ;;  %v2017_v49 = vsub.f32 %v4683_v2, %v4791_v7 }
 0x291   : > { %3701 = vrcp.f32 %v1674_v8  ;;  %v1731_v61 = vand.u32 2147483648, %v1674_v8  ;;  %vm1725_vm8 = vweird.f32 %v1674_v8 }
 0x292   : > { %3463 = vmatmul.msk.f32.vlgmr.msra.gmra.mxu3 %vm975_vm1, %v1779_v52  ;;  %3703 = vpow2.f32 %v2039_v23  ;;  %v2041_v57 = vmul.f32 1.442695, %v2017_v49 }
 0x293   : > { %v4841_v50 = vpop.eup %3697  ;;  %2680 = vmatpush.msra.mxu3 %v3803_v60  ;;  %v1732_v42 = vor.u32 1.1754944e-38, %v1731_v61 }
 0x294   : > { %v2002_v43 = vpop.xlane.xlu2 %2001  ;;  %2097 = vrot.lane.b32.xlu1 %v4841_v50, %s4008_s24  ;;  %v4847_v25 = vpop.eup %3699 }
 0x295   : > { %v2022_v3 = vsub.f32 %v4755_v59, %v2002_v43  ;;  %v1729_v59 = vand.u32 2147483647, %v1674_v8  ;;  %v3804_v43 = vld [vmem:[%s4190_s8 + $0x40] sm:$0xff] }
 0x297   : > { %v2051_v58 = vmul.f32 1.442695, %v2022_v3  ;;  %v3702_v18 = vpop.eup %3701  ;;  %vm1730_vm10 = vcmp.eq.f32.partialorder %v1729_v59, 8.507059e+37 }
 0x298   : > { %2085 = vrot.lane.b32.xlu2 %v4847_v25, %s4008_s24  ;;  %v1721_v19 = vmul.f32 %v3702_v18, %v1674_v8  ;;  %vm1726_vm7 = vweird.f32 %v3702_v18  ;;  %v4854_v4 = vpop.eup %3703 }
 0x299   : > { %3705 = vpow2.f32 %v2051_v58  ;;  %vm1727_vm9 = vmor %vm1725_vm8, %vm1726_vm7  ;;  %v1631_v58 = vsub.f32 %v4518_v53, %v4650_v31 }
 0x29a   : > { %v1722_v55 = vsub.f32 1.0, %v1721_v19  ;;  %3707 = vpow2.f32 %v2041_v57 }
 0x29c   : > { %v2005_v44 = vpop.xlane.xlu2 %2004  ;;  %v1723_v26 = vmul.f32 %v3702_v18, %v1722_v55 }
 0x29d   : > { %v2023_v20 = vsub.f32 %v4759_v47, %v2005_v44 }
 0x29e   : > { %v1724_v2 = vadd.f32 %v3702_v18, %v1723_v26 }
 0x29f   : > { %v4856_v16 = vpop.eup %3705  ;;  %v2053_v7 = vmul.f32 1.442695, %v2023_v20 }
 0x2a0   : > { %2099 = vrot.lane.b32.xlu1 %v4856_v16, %s4008_s24  ;;  %2087 = vrot.lane.b32.xlu2 %v4854_v4, %s4008_s24  ;;  %v1728_v52 = vsel %vm1727_vm9, %v3702_v18, %v1724_v2  ;;  %v4866_v8 = vpop.eup %3707 }
 0x2a1   : > { %3709 = vpow2.f32 %v2053_v7  ;;  %v1733_v47 = vsel %vm1730_vm10, %v1732_v42, %v1728_v52 }
 0x2a2   : > { %v1734_v60 = vmul.f32 %v4751_v39, %v1733_v47  ;;  %v1654_v39 = vmul.f32 1.442695, %v1631_v58  ;;  %v1630_v47 = vsub.f32 %v4550_v21, %v4673_v41  ;;  %v2018_v58 = vsub.f32 %v4717_v13, %v4807_v38 }
 0x2a4   : > { %v4863_v23 = vpop.xlane.xlu2 %1613  ;;  %3460 = vmatmul.msk.f32.vlgmr.msra.gmra.mxu0 %vm975_vm1, %v1734_v60  ;;  %v2043_v21 = vmul.f32 1.442695, %v2018_v58 }
 0x2a5   : > { %2611 = vmatpush.msra.mxu0 %v3804_v43 }
 0x2a7   : > { %v4869_v3 = vpop.eup %3709 }
 0x2a8   : > { %2101 = vrot.lane.b32.xlu1 %v4869_v3, %s4008_s24  ;;  %2089 = vrot.lane.b32.xlu2 %v4866_v8, %s4008_s24 }
 0x2ac   : > { %v1680_v18 = vpop.xlane.xlu2 %1679 }
 0x2ad   : > { %3711 = vrcp.f32 %v1680_v18  ;;  %v1761_v44 = vand.u32 2147483648, %v1680_v18  ;;  %v1759_v53 = vand.u32 2147483647, %v1680_v18  ;;  %vm1755_vm12 = vweird.f32 %v1680_v18 }
 0x2ae   : > { %3713 = vpow2.f32 %v1654_v39 }
 0x2af   : > { %v1762_v2 = vor.u32 1.1754944e-38, %v1761_v44  ;;  %vm1760_vm14 = vcmp.eq.f32.partialorder %v1759_v53, 8.507059e+37  ;;  %v1652_v44 = vmul.f32 1.442695, %v1630_v47  ;;  %v2020_v53 = vsub.f32 %v4746_v33, %v4825_v63 }
 0x2b0   : > { %v1632_v33 = vsub.f32 %v4631_v28, %v4774_v62 }
 0x2b3   : > { %v3712_v49 = vpop.eup %3711 }
 0x2b4   : > { %v1751_v19 = vmul.f32 %v3712_v49, %v1680_v18  ;;  %v1677_v55 = vpop.xlane.xlu2 %1676  ;;  %v4877_v57 = vpop.eup %3713  ;;  %vm1756_vm11 = vweird.f32 %v3712_v49  ;;  %v1629_v18 = vsub.f32 %v4562_v15, %v4685_v1  ;;  %v1635_v15 = vsub.f32 %v4552_v36, %v4671_v14 }
 0x2b5   : > { %3715 = vrcp.f32 %v1677_v55  ;;  %v1693_v31 = vsel %vm975_vm1, %v4877_v57, 0.0  ;;  %vm1757_vm13 = vmor %vm1755_vm12, %vm1756_vm11  ;;  %v1746_v39 = vand.u32 2147483648, %v1677_v55  ;;  %vm1740_vm2 = vweird.f32 %v1677_v55 }
 0x2b6   : > { %v1752_v61 = vsub.f32 1.0, %v1751_v19  ;;  %3717 = vpow2.f32 %v1652_v44 }
 0x2b7   : > { %v1747_v41 = vor.u32 1.1754944e-38, %v1746_v39  ;;  %3719 = vpow2.f32 %v2043_v21 }
 0x2b8   : > { %v1753_v26 = vmul.f32 %v3712_v49, %v1752_v61  ;;  %v1744_v61 = vand.u32 2147483647, %v1677_v55 }
 0x2ba   : > { %v1754_v59 = vadd.f32 %v3712_v49, %v1753_v26  ;;  %1694 = vadd.xlane.f32.xlu0 %v1693_v31  ;;  %vm1745_vm4 = vcmp.eq.f32.partialorder %v1744_v61, 8.507059e+37  ;;  %v3806_v31 = vld [vmem:[%s4190_s8 + $0x48] sm:$0xff] }
 0x2bb   : > { %v3716_v20 = vpop.eup %3715 }
 0x2bc   : > { %v1758_v7 = vsel %vm1757_vm13, %v3712_v49, %v1754_v59  ;;  %v1736_v42 = vmul.f32 %v3716_v20, %v1677_v55  ;;  %vm1741_vm15 = vweird.f32 %v3716_v20  ;;  %v3805_v49 = vld [vmem:[%s4190_s8 + $0x50] sm:$0xff]  ;;  %v1634_v55 = vsub.f32 %v4539_v35, %v4663_v10 }
 0x2bd   : > { %v1763_v52 = vsel %vm1760_vm14, %v1762_v2, %v1758_v7  ;;  %vm1742_vm3 = vmor %vm1740_vm2, %vm1741_vm15  ;;  %v1662_v59 = vmul.f32 1.442695, %v1635_v15  ;;  %v4899_v2 = vpop.eup %3717  ;;  %v2024_v35 = vsub.f32 %v4697_v56, %v4796_v48  ;;  %v1639_v10 = vsub.f32 %v4642_v5, %v4782_v30 }
 0x2be   : > { %v1737_v60 = vsub.f32 1.0, %v1736_v42  ;;  %v1764_v43 = vmul.f32 %v4772_v27, %v1763_v52  ;;  %v1650_v27 = vmul.f32 1.442695, %v1629_v18  ;;  %v1660_v7 = vmul.f32 1.442695, %v1634_v55  ;;  %v4901_v36 = vpop.eup %3719 }
 0x2bf   : > { %v1656_v42 = vmul.f32 1.442695, %v1632_v33  ;;  %v2055_v28 = vmul.f32 1.442695, %v2024_v35  ;;  %v1670_v52 = vmul.f32 1.442695, %v1639_v10  ;;  %v1636_v5 = vsub.f32 %v4766_v46, %v4863_v23 }
 0x2c0   : > { %v1738_v19 = vmul.f32 %v3716_v20, %v1737_v60  ;;  %3462 = vmatmul.msk.f32.vlgmr.msra.gmra.mxu2 %vm975_vm1, %v1764_v43  ;;  %3721 = vpow2.f32 %v1650_v27 }
 0x2c1   : > { %2657 = vmatpush.msra.mxu2 %v3805_v49  ;;  %3723 = vpow2.f32 %v1662_v59  ;;  %v1664_v43 = vmul.f32 1.442695, %v1636_v5 }
 0x2c2   : > { %v1739_v26 = vadd.f32 %v3716_v20, %v1738_v19 }
 0x2c4   : > { %v1743_v13 = vsel %vm1742_vm3, %v3716_v20, %v1739_v26  ;;  %v2047_v20 = vmul.f32 1.442695, %v2020_v53 }
 0x2c5   : > { %v1748_v38 = vsel %vm1745_vm4, %v1747_v41, %v1743_v13 }
 0x2c6   : > { %v1749_v1 = vmul.f32 %v4778_v34, %v1748_v38  ;;  %v4903_v14 = vpop.eup %3721  ;;  %3725 = vpow2.f32 %v2047_v20  ;;  %v1690_v34 = vsel %vm975_vm1, %v4899_v2, 0.0  ;;  %v2080_v13 = vpop.permute.xlu0 %2079  ;;  %v1628_v38 = vsub.f32 %v4512_v12, %v4639_v37 }
 0x2c7   : > { %3727 = vpow2.f32 %v1660_v7  ;;  %v1687_v63 = vsel %vm975_vm1, %v4903_v14, 0.0  ;;  %v4917_v62 = vpop.eup %3723  ;;  %v1638_v37 = vsub.f32 %v4654_v24, %v4789_v6 }
 0x2c8   : > { %3461 = vmatmul.msk.f32.vlgmr.msra.gmra.mxu1 %vm975_vm1, %v1749_v1  ;;  %3729 = vpow2.f32 %v1656_v42  ;;  %v1705_v30 = vsel %vm975_vm1, %v4917_v62, 0.0  ;;  %v2130_v1 = vsel %vm975_vm1, %v2080_v13, 0.0  ;;  %v1648_v53 = vmul.f32 1.442695, %v1628_v38 }
 0x2c9   : > { %2634 = vmatpush.msra.mxu1 %v3806_v31  ;;  %3731 = vpow2.f32 %v2055_v28  ;;  %v1633_v31 = vsub.f32 %v4629_v9, %v4794_v54  ;;  %v1637_v28 = vsub.f32 %v4709_v45, %v4805_v29 }
 0x2ca   : > { %3733 = vpow2.f32 %v1670_v52 }
 0x2cb   : > { %3735 = vpow2.f32 %v1664_v43  ;;  %v1658_v33 = vmul.f32 1.442695, %v1633_v31  ;;  %v1666_v6 = vmul.f32 1.442695, %v1637_v28 }
 0x2cc   : > { %v4919_v47 = vpop.eup %3725  ;;  %3737 = vpow2.f32 %v1648_v53 }
 0x2cd   : > { %v4921_v56 = vpop.eup %3727  ;;  %3739 = vpow2.f32 %v1658_v33 }
 0x2ce   : > { %2091 = vrot.lane.b32.xlu0 %v4901_v36, %s4008_s24  ;;  %v1702_v48 = vsel %vm975_vm1, %v4921_v56, 0.0  ;;  %v2074_v60 = vpop.permute.xlu2 %2073  ;;  %v4931_v58 = vpop.eup %3729 }
 0x2cf   : > { %v4933_v39 = vpop.eup %3731  ;;  %v1696_v46 = vsel %vm975_vm1, %v4931_v58, 0.0  ;;  %v2121_v21 = vsel %vm975_vm1, %v2074_v60, 0.0 }
 0x2d0   : > { %v4935_v18 = vpop.eup %3733 }
 0x2d1   : > { %1691 = vadd.xlane.f32.xlu2 %v1690_v34  ;;  %v1717_v23 = vsel %vm975_vm1, %v4935_v18, 0.0  ;;  %v4943_v61 = vpop.eup %3735 }
 0x2d2   : > { %1688 = vadd.xlane.f32.xlu1 %v1687_v63  ;;  %v1708_v49 = vsel %vm975_vm1, %v4943_v61, 0.0  ;;  %v4957_v35 = vpop.eup %3737  ;;  %v1668_v63 = vmul.f32 1.442695, %v1638_v37 }
 0x2d3   : > { %v1684_v34 = vsel %vm975_vm1, %v4957_v35, 0.0  ;;  %v4965_v42 = vpop.eup %3739 }
 0x2d4   : > { %3741 = vpow2.f32 %v1668_v63  ;;  %v1699_v24 = vsel %vm975_vm1, %v4965_v42, 0.0 }
 0x2d5   : > { %3743 = vpow2.f32 %v1666_v6 }
 0x2d6   : > { %2095 = vrot.lane.b32.xlu0 %v4919_v47, %s4008_s24 }
 0x2d9   : > { %1706 = vadd.xlane.f32.xlu2 %v1705_v30 }
 0x2da   : > { %1703 = vadd.xlane.f32.xlu1 %v1702_v48  ;;  %v4971_v52 = vpop.eup %3741 }
 0x2db   : > { %v1714_v30 = vsel %vm975_vm1, %v4971_v52, 0.0  ;;  %v4980_v45 = vpop.eup %3743 }
 0x2dc   : > { %v1711_v29 = vsel %vm975_vm1, %v4980_v45, 0.0 }
 0x2de   : > { %2103 = vrot.lane.b32.xlu0 %v4933_v39, %s4008_s24 }
 0x2e1   : > { %1697 = vadd.xlane.f32.xlu2 %v1696_v46 }
 0x2e2   : > { %1718 = vadd.xlane.f32.xlu1 %v1717_v23  ;;  %v2078_v19 = vpop.permute.xlu2 %2077 }
 0x2e3   : > { %v2127_v44 = vsel %vm975_vm1, %v2078_v19, 0.0 }
 0x2e9   : > { %1709 = vadd.xlane.f32.xlu2 %v1708_v49 }
 0x2ea   : > { %2128 = vadd.xlane.f32.xlu1 %v2127_v44  ;;  %v2084_v26 = vpop.permute.xlu2 %2083 }
 0x2eb   : > { %v2136_v41 = vsel %vm975_vm1, %v2084_v26, 0.0 }
 0x2f1   : > { %2122 = vadd.xlane.f32.xlu2 %v2121_v21 }
 0x2f2   : > { %2137 = vadd.xlane.f32.xlu1 %v2136_v41  ;;  %v2086_v27 = vpop.permute.xlu2 %2085  ;;  %v2076_v15 = vpop.permute.xlu1 %2075 }
 0x2f3   : > { %v2139_v7 = vsel %vm975_vm1, %v2086_v27, 0.0  ;;  %v2124_v43 = vsel %vm975_vm1, %v2076_v15, 0.0 }
 0x2f9   : > { %2131 = vadd.xlane.f32.xlu2 %v2130_v1 }
 0x2fa   : > { %v2088_v55 = vpop.permute.xlu2 %2087 }
 0x2fb   : > { %v2142_v21 = vsel %vm975_vm1, %v2088_v55, 0.0 }
 0x2fe   : > { %v2094_v59 = vpop.permute.xlu1 %2093 }
 0x2ff   : > { %v2151_v20 = vsel %vm975_vm1, %v2094_v59, 0.0 }
 0x300   : > { %2152 = vadd.xlane.f32.xlu1 %v2151_v20 }
 0x301   : > { %2140 = vadd.xlane.f32.xlu2 %v2139_v7  ;;  %v3807_v7 = vld [vmem:[%s4190_s8 + $0x78] sm:$0xff] }
 0x302   : > { %v2090_v12 = vpop.permute.xlu2 %2089  ;;  %v2082_v60 = vpop.permute.xlu0 %2081 }
 0x303   : > { %v2145_v54 = vsel %vm975_vm1, %v2090_v12, 0.0  ;;  %v2133_v23 = vsel %vm975_vm1, %v2082_v60, 0.0 }
 0x306   : > { %v2098_v10 = vpop.permute.xlu1 %2097 }
 0x307   : > { %v2157_v9 = vsel %vm975_vm1, %v2098_v10, 0.0 }
 0x308   : > { %1685 = vadd.xlane.f32.xlu0 %v1684_v34  ;;  %2158 = vadd.xlane.f32.xlu1 %v2157_v9 }
 0x309   : > { %2146 = vadd.xlane.f32.xlu2 %v2145_v54 }
 0x310   : > { %1700 = vadd.xlane.f32.xlu0 %v1699_v24 }
 0x312   : > { %v2100_v19 = vpop.permute.xlu1 %2099 }
 0x315   : > { %v2498_v5 = vpop.f32.mrf.mxu3 }
 0x316   : > { %2780 = vst.msk [vmem:[%s4974_s15 + $0x18] sm:$0xff] %vm414_vm0, %v2498_v5 }
 0x318   : > { %1715 = vadd.xlane.f32.xlu0 %v1714_v30 }
 0x31a   : > { %v2102_v1 = vpop.permute.xlu1 %2101 }
 0x320   : > { %1712 = vadd.xlane.f32.xlu0 %v1711_v29 }
 0x321   : > { %v2429_v48 = vpop.f32.mrf.mxu0 }
 0x322   : > { %2777 = vst.msk [vmem:[%s4974_s15] sm:$0xff] %vm414_vm0, %v2429_v48  ;;  %v2160_v48 = vsel %vm975_vm1, %v2100_v19, 0.0 }
 0x328   : > { %2125 = vadd.xlane.f32.xlu0 %v2124_v43 }
 0x32d   : > { %v1695_v46 = vpop.xlane.xlu0 %1694 }
 0x32e   : > { %3745 = vrcp.f32 %v1695_v46  ;;  %v1836_v41 = vand.u32 2147483648, %v1695_v46  ;;  %v1834_v13 = vand.u32 2147483647, %v1695_v46  ;;  %vm1830_vm6 = vweird.f32 %v1695_v46 }
 0x330   : > { %2134 = vadd.xlane.f32.xlu0 %v2133_v23  ;;  %v1837_v15 = vor.u32 1.1754944e-38, %v1836_v41  ;;  %vm1835_vm8 = vcmp.eq.f32.partialorder %v1834_v13, 8.507059e+37 }
 0x334   : > { %v3746_v49 = vpop.eup %3745 }
 0x335   : > { %v1826_v44 = vmul.f32 %v3746_v49, %v1695_v46  ;;  %vm1831_vm5 = vweird.f32 %v3746_v49 }
 0x336   : > { %vm1832_vm7 = vmor %vm1830_vm6, %vm1831_vm5 }
 0x337   : > { %v1827_v26 = vsub.f32 1.0, %v1826_v44 }
 0x338   : > { %2143 = vadd.xlane.f32.xlu0 %v2142_v21 }
 0x339   : > { %v1828_v27 = vmul.f32 %v3746_v49, %v1827_v26 }
 0x33b   : > { %v1829_v38 = vadd.f32 %v3746_v49, %v1828_v27 }
 0x33d   : > { %v1833_v53 = vsel %vm1832_vm7, %v3746_v49, %v1829_v38 }
 0x33e   : > { %v1838_v31 = vsel %vm1835_vm8, %v1837_v15, %v1833_v53 }
 0x33f   : > { %v1839_v59 = vmul.f32 %v4877_v57, %v1838_v31  ;;  %v2163_v57 = vsel %vm975_vm1, %v2102_v1, 0.0 }
 0x340   : > { %v2092_v20 = vpop.permute.xlu0 %2091 }
 0x341   : > { %3467 = vmatmul.msk.f32.vlgmr.msrb.gmra.mxu3 %vm975_vm1, %v1839_v59  ;;  %v2148_v55 = vsel %vm975_vm1, %v2092_v20, 0.0 }
 0x342   : > { %2149 = vadd.xlane.f32.xlu0 %v2148_v55  ;;  %2772 = vmatpush.msrb.mxu3 %v3807_v7 }
 0x343   : > { %v2475_v33 = vpop.f32.mrf.mxu2 }
 0x344   : > { %2779 = vst.msk [vmem:[%s4974_s15 + $0x10] sm:$0xff] %vm414_vm0, %v2475_v33  ;;  %v1692_v12 = vpop.xlane.xlu2 %1691 }
 0x345   : > { %3747 = vrcp.f32 %v1692_v12  ;;  %v1689_v37 = vpop.xlane.xlu1 %1688  ;;  %v2452_v10 = vpop.f32.mrf.mxu1  ;;  %v1819_v43 = vand.u32 2147483647, %v1692_v12  ;;  %v1821_v46 = vand.u32 2147483648, %v1692_v12  ;;  %vm1815_vm11 = vweird.f32 %v1692_v12 }
 0x346   : > { %3749 = vrcp.f32 %v1689_v37  ;;  %2778 = vst.msk [vmem:[%s4974_s15 + $0x8] sm:$0xff] %vm414_vm0, %v2452_v10  ;;  %v1806_v44 = vand.u32 2147483648, %v1689_v37  ;;  %v1804_v41 = vand.u32 2147483647, %v1689_v37  ;;  %vm1800_vm13 = vweird.f32 %v1689_v37 }
 0x347   : > { %v1822_v15 = vor.u32 1.1754944e-38, %v1821_v46  ;;  %vm1820_vm15 = vcmp.eq.f32.partialorder %v1819_v43, 8.507059e+37  ;;  %v3808_v43 = vld [vmem:[%s4190_s8 + $0x70] sm:$0xff] }
 0x348   : > { %v2096_v34 = vpop.permute.xlu0 %2095  ;;  %v1807_v59 = vor.u32 1.1754944e-38, %v1806_v44  ;;  %vm1805_vm2 = vcmp.eq.f32.partialorder %v1804_v41, 8.507059e+37  ;;  %v3809_v44 = vld [vmem:[%s4190_s8 + $0x68] sm:$0xff] }
 0x349   : > { %v2154_v9 = vsel %vm975_vm1, %v2096_v34, 0.0 }
 0x34a   : > { %2164 = vadd.xlane.f32.xlu0 %v2163_v57  ;;  %2155 = vadd.xlane.f32.xlu2 %v2154_v9 }
 0x34b   : > { %v3748_v54 = vpop.eup %3747 }
 0x34c   : > { %v3750_v63 = vpop.eup %3749  ;;  %v1811_v28 = vmul.f32 %v3748_v54, %v1692_v12  ;;  %v4999_v24 = vpop.xlane.xlu2 %1706  ;;  %vm1816_vm9 = vweird.f32 %v3748_v54 }
 0x34d   : > { %v1796_v6 = vmul.f32 %v3750_v63, %v1689_v37  ;;  %3751 = vrcp.f32 %v4999_v24  ;;  %v5002_v5 = vpop.xlane.xlu1 %1703  ;;  %vm1801_vm10 = vweird.f32 %v3750_v63  ;;  %vm1817_vm12 = vmor %vm1815_vm11, %vm1816_vm9  ;;  %v1894_v34 = vand.u32 2147483647, %v4999_v24 }
 0x34e   : > { %v1812_v30 = vsub.f32 1.0, %v1811_v28  ;;  %3753 = vrcp.f32 %v5002_v5  ;;  %vm1802_vm14 = vmor %vm1800_vm13, %vm1801_vm10  ;;  %v1896_v57 = vand.u32 2147483648, %v4999_v24  ;;  %vm1890_vm5 = vweird.f32 %v4999_v24 }
 0x34f   : > { %v1797_v29 = vsub.f32 1.0, %v1796_v6  ;;  %v1879_v6 = vand.u32 2147483647, %v5002_v5  ;;  %vm1875_vm7 = vweird.f32 %v5002_v5  ;;  %vm1895_vm9 = vcmp.eq.f32.partialorder %v1894_v34, 8.507059e+37 }
 0x350   : > { %v1813_v60 = vmul.f32 %v3748_v54, %v1812_v30  ;;  %v2104_v23 = vpop.permute.xlu0 %2103 }
 0x351   : > { %v1798_v49 = vmul.f32 %v3750_v63, %v1797_v29  ;;  %v2166_v26 = vsel %vm975_vm1, %v2104_v23, 0.0  ;;  %vm1880_vm10 = vcmp.eq.f32.partialorder %v1879_v6, 8.507059e+37 }
 0x352   : > { %v1814_v21 = vadd.f32 %v3748_v54, %v1813_v60  ;;  %2167 = vadd.xlane.f32.xlu1 %v2166_v26  ;;  %2161 = vadd.xlane.f32.xlu2 %v2160_v48  ;;  %v1897_v60 = vor.u32 1.1754944e-38, %v1896_v57 }
 0x353   : > { %v3752_v27 = vpop.eup %3751  ;;  %v1799_v13 = vadd.f32 %v3750_v63, %v1798_v49 }
 0x354   : > { %v3754_v19 = vpop.eup %3753  ;;  %v1818_v38 = vsel %vm1817_vm12, %v3748_v54, %v1814_v21  ;;  %v1886_v1 = vmul.f32 %v3752_v27, %v4999_v24  ;;  %v5009_v53 = vpop.xlane.xlu2 %1697  ;;  %vm1891_vm3 = vweird.f32 %v3752_v27  ;;  %v1881_v54 = vand.u32 2147483648, %v5002_v5 }
 0x355   : > { %v1803_v31 = vsel %vm1802_vm14, %v3750_v63, %v1799_v13  ;;  %v1871_v20 = vmul.f32 %v3754_v19, %v5002_v5  ;;  %v1719_v55 = vpop.xlane.xlu1 %1718  ;;  %v1823_v7 = vsel %vm1820_vm15, %v1822_v15, %v1818_v38  ;;  %vm1876_vm4 = vweird.f32 %v3754_v19  ;;  %vm5019_vm6 = vmor %vm1890_vm5, %vm1891_vm3 }
 0x356   : > { %v1887_v33 = vsub.f32 1.0, %v1886_v1  ;;  %v1808_v12 = vsel %vm1805_vm2, %v1807_v59, %v1803_v31  ;;  %3755 = vrcp.f32 %v1719_v55  ;;  %v1824_v63 = vmul.f32 %v4899_v2, %v1823_v7  ;;  %vm5027_vm8 = vmor %vm1875_vm7, %vm1876_vm4 }
 0x357   : > { %v1872_v37 = vsub.f32 1.0, %v1871_v20  ;;  %v1809_v30 = vmul.f32 %v4903_v14, %v1808_v12  ;;  %v1882_v23 = vor.u32 1.1754944e-38, %v1881_v54  ;;  %v1956_v13 = vand.u32 2147483648, %v1719_v55 }
 0x358   : > { %v1888_v10 = vmul.f32 %v3752_v27, %v1887_v33  ;;  %3466 = vmatmul.msk.f32.vlgmr.msrb.gmra.mxu2 %vm975_vm1, %v1824_v63  ;;  %v1954_v1 = vand.u32 2147483647, %v1719_v55  ;;  %vm1950_vm12 = vweird.f32 %v1719_v55 }
 0x359   : > { %v1873_v9 = vmul.f32 %v3754_v19, %v1872_v37  ;;  %3465 = vmatmul.msk.f32.vlgmr.msrb.gmra.mxu1 %vm975_vm1, %v1809_v30  ;;  %2749 = vmatpush.msrb.mxu2 %v3808_v43  ;;  %v1957_v20 = vor.u32 1.1754944e-38, %v1956_v13 }
 0x35a   : > { %v1889_v28 = vadd.f32 %v3752_v27, %v1888_v10  ;;  %2726 = vmatpush.msrb.mxu1 %v3809_v44  ;;  %vm1955_vm14 = vcmp.eq.f32.partialorder %v1954_v1, 8.507059e+37 }
 0x35b   : > { %v1874_v48 = vadd.f32 %v3754_v19, %v1873_v9 }
 0x35c   : > { %v1893_v2 = vsel %vm5019_vm6, %v3752_v27, %v1889_v28  ;;  %v5032_v14 = vpop.xlane.xlu2 %1709  ;;  %v3756_v46 = vpop.eup %3755 }
 0x35d   : > { %v1878_v5 = vsel %vm5027_vm8, %v3754_v19, %v1874_v48  ;;  %v5037_v49 = vpop.xlane.xlu1 %2128  ;;  %v1898_v26 = vsel %vm1895_vm9, %v1897_v60, %v1893_v2  ;;  %v1946_v21 = vmul.f32 %v3756_v46, %v1719_v55  ;;  %vm1951_vm11 = vweird.f32 %v3756_v46 }
 0x35e   : > { %v1883_v41 = vsel %vm1880_vm10, %v1882_v23, %v1878_v5  ;;  %v1899_v38 = vmul.f32 %v4917_v62, %v1898_v26  ;;  %vm1952_vm13 = vmor %vm1950_vm12, %vm1951_vm11 }
 0x35f   : > { %v1947_v27 = vsub.f32 1.0, %v1946_v21  ;;  %v1884_v31 = vmul.f32 %v4921_v56, %v1883_v41 }
 0x360   : > { %3471 = vmatmul.msk.f32.vlgmr.msra.gmra.mxu3 %vm975_vm1, %v1899_v38 }
 0x361   : > { %v1948_v15 = vmul.f32 %v3756_v46, %v1947_v27  ;;  %3470 = vmatmul.msk.f32.vlgmr.msra.gmra.mxu2 %vm975_vm1, %v1884_v31 }
 0x363   : > { %v1949_v19 = vadd.f32 %v3756_v46, %v1948_v15 }
 0x364   : > { %v2123_v59 = vpop.xlane.xlu2 %2122 }
 0x365   : > { %3757 = vrcp.f32 %v2123_v59  ;;  %v2138_v7 = vpop.xlane.xlu1 %2137  ;;  %v1953_v33 = vsel %vm1952_vm13, %v3756_v46, %v1949_v19  ;;  %v2180_v63 = vand.u32 2147483648, %v2123_v59  ;;  %v2178_v29 = vand.u32 2147483647, %v2123_v59 }
 0x366   : > { %v1958_v12 = vsel %vm1955_vm14, %v1957_v20, %v1953_v33  ;;  %3759 = vrcp.f32 %v2138_v7  ;;  %vm2174_vm2 = vweird.f32 %v2123_v59  ;;  %v2255_v5 = vand.u32 2147483648, %v2138_v7 }
 0x367   : > { %v1959_v62 = vmul.f32 %v4935_v18, %v1958_v12  ;;  %v2181_v2 = vor.u32 1.1754944e-38, %v2180_v63  ;;  %vm2179_vm5 = vcmp.eq.f32.partialorder %v2178_v29, 8.507059e+37  ;;  %vm2249_vm6 = vweird.f32 %v2138_v7 }
 0x368   : > { %v2253_v44 = vand.u32 2147483647, %v2138_v7  ;;  %v2256_v1 = vor.u32 1.1754944e-38, %v2255_v5  ;;  %vm1845_vm14 = vweird.f32 %v5009_v53 }
 0x369   : > { %3475 = vmatmul.msk.f32.vlgmr.msrb.gmra.mxu3 %vm975_vm1, %v1959_v62 }
 0x36a   : > { %vm2254_vm8 = vcmp.eq.f32.partialorder %v2253_v44, 8.507059e+37 }
 0x36b   : > { %v3758_v37 = vpop.eup %3757 }
 0x36c   : > { %v2170_v56 = vmul.f32 %v3758_v37, %v2123_v59  ;;  %v2132_v10 = vpop.xlane.xlu2 %2131  ;;  %v3760_v34 = vpop.eup %3759  ;;  %vm2175_vm15 = vweird.f32 %v3758_v37 }
 0x36d   : > { %3761 = vrcp.f32 %v2132_v10  ;;  %v2245_v57 = vmul.f32 %v3760_v34, %v2138_v7  ;;  %vm2176_vm3 = vmor %vm2174_vm2, %vm2175_vm15  ;;  %vm2250_vm4 = vweird.f32 %v3760_v34  ;;  %v2225_v31 = vand.u32 2147483648, %v2132_v10 }
 0x36e   : > { %v2171_v55 = vsub.f32 1.0, %v2170_v56  ;;  %3763 = vrcp.f32 %v5009_v53  ;;  %vm5053_vm7 = vmor %vm2249_vm6, %vm2250_vm4  ;;  %v2223_v20 = vand.u32 2147483647, %v2132_v10  ;;  %vm2219_vm10 = vweird.f32 %v2132_v10 }
 0x36f   : > { %v2246_v54 = vsub.f32 1.0, %v2245_v57  ;;  %v2226_v62 = vor.u32 1.1754944e-38, %v2225_v31 }
 0x370   : > { %v2172_v9 = vmul.f32 %v3758_v37, %v2171_v55  ;;  %vm2224_vm12 = vcmp.eq.f32.partialorder %v2223_v20, 8.507059e+37  ;;  %v1851_v20 = vand.u32 2147483648, %v5009_v53 }
 0x371   : > { %v2247_v6 = vmul.f32 %v3760_v34, %v2246_v54 }
 0x372   : > { %v2173_v30 = vadd.f32 %v3758_v37, %v2172_v9 }
 0x373   : > { %v3762_v28 = vpop.eup %3761  ;;  %v2248_v24 = vadd.f32 %v3760_v34, %v2247_v6 }
 0x374   : > { %v2215_v18 = vmul.f32 %v3762_v28, %v2132_v10  ;;  %v5047_v48 = vpop.xlane.xlu2 %2140  ;;  %v2177_v43 = vsel %vm2176_vm3, %v3758_v37, %v2173_v30  ;;  %v5050_v46 = vpop.eup %3763  ;;  %vm2220_vm9 = vweird.f32 %v3762_v28 }
 0x375   : > { %3765 = vrcp.f32 %v5047_v48  ;;  %v2182_v23 = vsel %vm2179_vm5, %v2181_v2, %v2177_v43  ;;  %v1841_v13 = vmul.f32 %v5050_v46, %v5009_v53  ;;  %v2252_v15 = vsel %vm5053_vm7, %v3760_v34, %v2248_v24  ;;  %vm2221_vm11 = vmor %vm2219_vm10, %vm2220_vm9 }
 0x376   : > { %v2216_v60 = vsub.f32 1.0, %v2215_v18  ;;  %v2183_v21 = vmul.f32 %v4800_v51, %v2182_v23  ;;  %3767 = vrcp.f32 %v5032_v14  ;;  %v2257_v33 = vsel %vm2254_vm8, %v2256_v1, %v2252_v15 }
 0x377   : > { %v1842_v12 = vsub.f32 1.0, %v1841_v13  ;;  %v2270_v34 = vand.u32 2147483648, %v5047_v48  ;;  %v2258_v55 = vmul.f32 %v4829_v0, %v2257_v33  ;;  %v2268_v63 = vand.u32 2147483647, %v5047_v48 }
 0x378   : > { %v2217_v26 = vmul.f32 %v3762_v28, %v2216_v60  ;;  %2794 = vrot.lane.b32.xlu0 %v2183_v21, %s4008_s24  ;;  %vm2264_vm15 = vweird.f32 %v5047_v48  ;;  %v1849_v18 = vand.u32 2147483647, %v5009_v53  ;;  %vm1846_vm5 = vweird.f32 %v5050_v46 }
 0x379   : > { %v1843_v29 = vmul.f32 %v5050_v46, %v1842_v12  ;;  %v2271_v60 = vor.u32 1.1754944e-38, %v2270_v34  ;;  %vm2269_vm3 = vcmp.eq.f32.partialorder %v2268_v63, 8.507059e+37  ;;  %vm5106_vm10 = vmor %vm1845_vm14, %vm1846_vm5 }
 0x37a   : > { %v2218_v59 = vadd.f32 %v3762_v28, %v2217_v26 }
 0x37b   : > { %v3766_v27 = vpop.eup %3765  ;;  %v5061_v38 = vpop.xlane.xlu0 %1685  ;;  %v1844_v26 = vadd.f32 %v5050_v46, %v1843_v29  ;;  %v3810_v29 = vld [vmem:[%s4190_s8 + $0x60] sm:$0xff]  ;;  %s3210_s8 = scalar_lea.sflag [#allocation4], %s4183_s0 }
 0x37c   : > { %v2260_v51 = vmul.f32 %v3766_v27, %v5047_v48  ;;  %3769 = vrcp.f32 %v5061_v38  ;;  %v5067_v19 = vpop.xlane.xlu2 %2146  ;;  %v5070_v56 = vpop.eup %3767  ;;  %v2222_v57 = vsel %vm2221_vm11, %v3762_v28, %v2218_v59  ;;  %vm2265_vm13 = vweird.f32 %v3766_v27 }
 0x37d   : > { %3771 = vrcp.f32 %v5067_v19  ;;  %v2227_v10 = vsel %vm2224_vm12, %v2226_v62, %v2222_v57  ;;  %v1901_v2 = vmul.f32 %v5070_v56, %v5032_v14  ;;  %vm2266_vm2 = vmor %vm2264_vm15, %vm2265_vm13  ;;  %v1791_v43 = vand.u32 2147483648, %v5061_v38 }
 0x37e   : > { %v2261_v7 = vsub.f32 1.0, %v2260_v51  ;;  %v2228_v0 = vmul.f32 %v4785_v11, %v2227_v10  ;;  %v1789_v23 = vand.u32 2147483647, %v5061_v38  ;;  %vm1785_vm6 = vweird.f32 %v5061_v38 }
 0x37f   : > { %v1902_v13 = vsub.f32 1.0, %v1901_v2  ;;  %v2300_v1 = vand.u32 2147483648, %v5067_v19  ;;  %v2298_v59 = vand.u32 2147483647, %v5067_v19  ;;  %vm2294_vm11 = vweird.f32 %v5067_v19 }
 0x380   : > { %v2262_v37 = vmul.f32 %v3766_v27, %v2261_v7  ;;  %2919 = vrot.lane.b32.xlu0 %v2258_v55, %s4008_s24  ;;  %2869 = vrot.lane.b32.xlu2 %v2228_v0, %s4008_s24  ;;  %vm1790_vm9 = vcmp.eq.f32.partialorder %v1789_v23, 8.507059e+37  ;;  %vm1850_vm15 = vcmp.eq.f32.partialorder %v1849_v18, 8.507059e+37  ;;  %v1911_v18 = vand.u32 2147483648, %v5032_v14 }
 0x381   : > { %v2301_v34 = vor.u32 1.1754944e-38, %v2300_v1  ;;  %v1903_v57 = vmul.f32 %v5070_v56, %v1902_v13  ;;  %vm2299_vm13 = vcmp.eq.f32.partialorder %v2298_v59, 8.507059e+37 }
 0x382   : > { %v3770_v9 = vpop.eup %3769  ;;  %v2263_v54 = vadd.f32 %v3766_v27, %v2262_v37  ;;  %v1848_v37 = vsel %vm5106_vm10, %v5050_v46, %v1844_v26  ;;  %v1852_v46 = vor.u32 1.1754944e-38, %v1851_v20 }
 0x383   : > { %v1781_v6 = vmul.f32 %v3770_v9, %v5061_v38  ;;  %v5078_v30 = vpop.xlane.xlu0 %1700  ;;  %v3772_v28 = vpop.eup %3771  ;;  %vm1786_vm4 = vweird.f32 %v3770_v9 }
 0x384   : > { %3773 = vrcp.f32 %v5078_v30  ;;  %v2290_v5 = vmul.f32 %v3772_v28, %v5067_v19  ;;  %v2267_v48 = vsel %vm2266_vm2, %v3766_v27, %v2263_v54  ;;  %vm1787_vm7 = vmor %vm1785_vm6, %vm1786_vm4  ;;  %v1792_v27 = vor.u32 1.1754944e-38, %v1791_v43 }
 0x385   : > { %v1782_v24 = vsub.f32 1.0, %v1781_v6  ;;  %v2272_v44 = vsel %vm2269_vm3, %v2271_v60, %v2267_v48  ;;  %vm2295_vm8 = vweird.f32 %v3772_v28  ;;  %v1864_v19 = vand.u32 2147483647, %v5078_v30 }
 0x386   : > { %v2291_v21 = vsub.f32 1.0, %v2290_v5  ;;  %v2273_v41 = vmul.f32 %v4847_v25, %v2272_v44  ;;  %vm2296_vm12 = vmor %vm2294_vm11, %vm2295_vm8  ;;  %vm1860_vm2 = vweird.f32 %v5078_v30  ;;  %v1853_v2 = vsel %vm1850_vm15, %v1852_v46, %v1848_v37 }
 0x387   : > { %v1783_v11 = vmul.f32 %v3770_v9, %v1782_v24  ;;  %vm1906_vm3 = vweird.f32 %v5070_v56  ;;  %v1904_v60 = vadd.f32 %v5070_v56, %v1903_v57  ;;  %vm1865_vm5 = vcmp.eq.f32.partialorder %v1864_v19, 8.507059e+37 }
 0x388   : > { %v2292_v51 = vmul.f32 %v3772_v28, %v2291_v21  ;;  %2944 = vrot.lane.b32.xlu0 %v2273_v41, %s4008_s24  ;;  %vm1905_vm6 = vweird.f32 %v5032_v14  ;;  %v1909_v5 = vand.u32 2147483647, %v5032_v14 }
 0x389   : > { %v1784_v15 = vadd.f32 %v3770_v9, %v1783_v11  ;;  %v1854_v11 = vmul.f32 %v4931_v58, %v1853_v2  ;;  %v1912_v58 = vor.u32 1.1754944e-38, %v1911_v18 }
 0x38a   : > { %v3774_v31 = vpop.eup %3773  ;;  %v2293_v62 = vadd.f32 %v3772_v28, %v2292_v51 }
 0x38b   : > { %v1788_v7 = vsel %vm1787_vm7, %v3770_v9, %v1784_v15  ;;  %v1856_v33 = vmul.f32 %v3774_v31, %v5078_v30  ;;  %v5100_v25 = vpop.xlane.xlu0 %1715  ;;  %v1866_v9 = vand.u32 2147483648, %v5078_v30  ;;  %vm1861_vm14 = vweird.f32 %v3774_v31  ;;  %vm1907_vm7 = vmor %vm1905_vm6, %vm1906_vm3 }
 0x38c   : > { %v1793_v12 = vsel %vm1790_vm9, %v1792_v27, %v1788_v7  ;;  %3775 = vrcp.f32 %v5100_v25  ;;  %v2297_v54 = vsel %vm2296_vm12, %v3772_v28, %v2293_v62  ;;  %vm1862_vm4 = vmor %vm1860_vm2, %vm1861_vm14  ;;  %v1941_v44 = vand.u32 2147483648, %v5100_v25 }
 0x38d   : > { %v1857_v55 = vsub.f32 1.0, %v1856_v33  ;;  %v1794_v53 = vmul.f32 %v4957_v35, %v1793_v12  ;;  %v2302_v10 = vsel %vm2299_vm13, %v2301_v34, %v2297_v54  ;;  %v1867_v28 = vor.u32 1.1754944e-38, %v1866_v9 }
 0x38e   : > { %v2303_v6 = vmul.f32 %v4866_v8, %v2302_v10  ;;  %v1908_v26 = vsel %vm1907_vm7, %v5070_v56, %v1904_v60  ;;  %v1939_v41 = vand.u32 2147483647, %v5100_v25  ;;  %vm1910_vm9 = vcmp.eq.f32.partialorder %v1909_v5, 8.507059e+37 }
 0x38f   : > { %v1858_v63 = vmul.f32 %v3774_v31, %v1857_v55  ;;  %3464 = vmatmul.msk.f32.vlgmr.msrb.gmra.mxu0 %vm975_vm1, %v1794_v53  ;;  %vm1935_vm10 = vweird.f32 %v5100_v25  ;;  %v1913_v13 = vsel %vm1910_vm9, %v1912_v58, %v1908_v26  ;;  %v1942_v15 = vor.u32 1.1754944e-38, %v1941_v44 }
 0x390   : > { %2703 = vmatpush.msrb.mxu0 %v3810_v29  ;;  %2994 = vrot.lane.b32.xlu0 %v2303_v6, %s4008_s24  ;;  %vm1940_vm12 = vcmp.eq.f32.partialorder %v1939_v41, 8.507059e+37  ;;  %v1914_v20 = vmul.f32 %v4943_v61, %v1913_v13  ;;  %v5149_v61 = vpop.xlane.xlu1 %2152 }
 0x391   : > { %v1859_v35 = vadd.f32 %v3774_v31, %v1858_v63 }
 0x392   : > { %v3776_v0 = vpop.eup %3775 }
 0x393   : > { %v1863_v24 = vsel %vm1862_vm4, %v3774_v31, %v1859_v35  ;;  %v1931_v43 = vmul.f32 %v3776_v0, %v5100_v25  ;;  %v1713_v8 = vpop.xlane.xlu0 %1712  ;;  %vm1936_vm8 = vweird.f32 %v3776_v0 }
 0x394   : > { %v1868_v30 = vsel %vm1865_vm5, %v1867_v28, %v1863_v24  ;;  %3777 = vrcp.f32 %v1713_v8  ;;  %vm1937_vm11 = vmor %vm1935_vm10, %vm1936_vm8  ;;  %v1926_v33 = vand.u32 2147483648, %v1713_v8  ;;  %v1924_v12 = vand.u32 2147483647, %v1713_v8 }
 0x395   : > { %v1932_v48 = vsub.f32 1.0, %v1931_v43  ;;  %v1869_v23 = vmul.f32 %v4965_v42, %v1868_v30  ;;  %3779 = vrcp.f32 %v5037_v49  ;;  %vm1920_vm14 = vweird.f32 %v1713_v8 }
 0x396   : > { %v1927_v34 = vor.u32 1.1754944e-38, %v1926_v33  ;;  %vm1925_vm2 = vcmp.eq.f32.partialorder %v1924_v12, 8.507059e+37  ;;  %v2210_v43 = vand.u32 2147483648, %v5037_v49  ;;  %vm2204_vm8 = vweird.f32 %v5037_v49 }
 0x397   : > { %v1933_v21 = vmul.f32 %v3776_v0, %v1932_v48  ;;  %3468 = vmatmul.msk.f32.vlgmr.msra.gmra.mxu0 %vm975_vm1, %v1854_v11  ;;  %3469 = vmatmul.msk.f32.vlgmr.msra.gmra.mxu1 %vm975_vm1, %v1869_v23  ;;  %v2208_v30 = vand.u32 2147483647, %v5037_v49 }
 0x398   : > { %v2211_v23 = vor.u32 1.1754944e-38, %v2210_v43  ;;  %v5172_v44 = vpop.xlane.xlu1 %2158 }
 0x399   : > { %v1934_v42 = vadd.f32 %v3776_v0, %v1933_v21  ;;  %vm2209_vm10 = vcmp.eq.f32.partialorder %v2208_v30, 8.507059e+37 }
 0x39a   : > { %v3778_v14 = vpop.eup %3777 }
 0x39b   : > { %v1938_v1 = vsel %vm1937_vm11, %v3776_v0, %v1934_v42  ;;  %v1916_v56 = vmul.f32 %v3778_v14, %v1713_v8  ;;  %v2126_v31 = vpop.xlane.xlu0 %2125  ;;  %v5141_v27 = vpop.eup %3779  ;;  %vm1921_vm13 = vweird.f32 %v3778_v14 }
 0x39c   : > { %v1943_v51 = vsel %vm1940_vm12, %v1942_v15, %v1938_v1  ;;  %3781 = vrcp.f32 %v2126_v31  ;;  %v2200_v25 = vmul.f32 %v5141_v27, %v5037_v49  ;;  %vm1922_vm15 = vmor %vm1920_vm14, %vm1921_vm13  ;;  %v2195_v46 = vand.u32 2147483648, %v2126_v31 }
 0x39d   : > { %v1917_v59 = vsub.f32 1.0, %v1916_v56  ;;  %v1944_v7 = vmul.f32 %v4971_v52, %v1943_v51  ;;  %v2193_v6 = vand.u32 2147483647, %v2126_v31  ;;  %vm2189_vm4 = vweird.f32 %v2126_v31 }
 0x39e   : > { %v2201_v55 = vsub.f32 1.0, %v2200_v25  ;;  %vm2205_vm6 = vweird.f32 %v5141_v27  ;;  %v2196_v0 = vor.u32 1.1754944e-38, %v2195_v46 }
 0x39f   : > { %v1918_v38 = vmul.f32 %v3778_v14, %v1917_v59  ;;  %3472 = vmatmul.msk.f32.vlgmr.msrb.gmra.mxu0 %vm975_vm1, %v1914_v20  ;;  %3474 = vmatmul.msk.f32.vlgmr.msrb.gmra.mxu2 %vm975_vm1, %v1944_v7  ;;  %vm2194_vm7 = vcmp.eq.f32.partialorder %v2193_v6, 8.507059e+37  ;;  %vm2206_vm9 = vmor %vm2204_vm8, %vm2205_vm6  ;;  %vm2324_vm6 = vweird.f32 %v5149_v61 }
 0x3a0   : > { %v2202_v19 = vmul.f32 %v5141_v27, %v2201_v55  ;;  %v2330_v55 = vand.u32 2147483648, %v5149_v61 }
 0x3a1   : > { %v1919_v62 = vadd.f32 %v3778_v14, %v1918_v38  ;;  %v383_v38 = vld [vmem:[%s4198_s17 + $0x18] sm:$0xff] }
 0x3a2   : > { %v3782_v37 = vpop.eup %3781  ;;  %v2203_v60 = vadd.f32 %v5141_v27, %v2202_v19  ;;  %2888 = vmatpush.msra.mxu3 %v383_v38  ;;  %v2331_v6 = vor.u32 1.1754944e-38, %v2330_v55 }
 0x3a3   : > { %v1923_v52 = vsel %vm1922_vm15, %v3778_v14, %v1919_v62  ;;  %v2185_v53 = vmul.f32 %v3782_v37, %v2126_v31  ;;  %v5151_v57 = vpop.xlane.xlu0 %2134  ;;  %vm2190_vm3 = vweird.f32 %v3782_v37 }
 0x3a4   : > { %v1928_v9 = vsel %vm1925_vm2, %v1927_v34, %v1923_v52  ;;  %3783 = vrcp.f32 %v5151_v57  ;;  %vm2191_vm5 = vmor %vm2189_vm4, %vm2190_vm3  ;;  %v2207_v11 = vsel %vm2206_vm9, %v5141_v27, %v2203_v60  ;;  %v2240_v42 = vand.u32 2147483648, %v5151_v57 }
 0x3a5   : > { %v2186_v54 = vsub.f32 1.0, %v2185_v53  ;;  %v1929_v63 = vmul.f32 %v4980_v45, %v1928_v9  ;;  %3785 = vrcp.f32 %v5149_v61  ;;  %v2212_v41 = vsel %vm2209_vm10, %v2211_v23, %v2207_v11 }
 0x3a6   : > { %v2213_v15 = vmul.f32 %v4817_v17, %v2212_v41  ;;  %vm2234_vm12 = vweird.f32 %v5151_v57  ;;  %v2238_v1 = vand.u32 2147483647, %v5151_v57  ;;  %v2241_v7 = vor.u32 1.1754944e-38, %v2240_v42 }
 0x3a7   : > { %v2187_v10 = vmul.f32 %v3782_v37, %v2186_v54  ;;  %3473 = vmatmul.msk.f32.vlgmr.msrb.gmra.mxu1 %vm975_vm1, %v1929_v63  ;;  %v2360_v11 = vand.u32 2147483648, %v5172_v44 }
 0x3a8   : > { %vm2239_vm3 = vcmp.eq.f32.partialorder %v2238_v1, 8.507059e+37  ;;  %v2358_v1 = vand.u32 2147483647, %v5172_v44 }
 0x3a9   : > { %v2188_v29 = vadd.f32 %v3782_v37, %v2187_v10 }
 0x3aa   : > { %v3784_v35 = vpop.eup %3783 }
 0x3ab   : > { %v2230_v2 = vmul.f32 %v3784_v35, %v5151_v57  ;;  %v2144_v45 = vpop.xlane.xlu0 %2143  ;;  %v2192_v28 = vsel %vm2191_vm5, %v3782_v37, %v2188_v29  ;;  %v5161_v24 = vpop.eup %3785  ;;  %vm2235_vm11 = vweird.f32 %v3784_v35  ;;  %v2328_v57 = vand.u32 2147483647, %v5149_v61 }
 0x3ac   : > { %3787 = vrcp.f32 %v2144_v45  ;;  %v2197_v18 = vsel %vm2194_vm7, %v2196_v0, %v2192_v28  ;;  %v2320_v48 = vmul.f32 %v5161_v24, %v5149_v61  ;;  %v2285_v56 = vand.u32 2147483648, %v2144_v45  ;;  %vm5184_vm13 = vmor %vm2234_vm12, %vm2235_vm11 }
 0x3ad   : > { %v2231_v8 = vsub.f32 1.0, %v2230_v2  ;;  %v2198_v5 = vmul.f32 %v4810_v32, %v2197_v18  ;;  %3789 = vrcp.f32 %v5172_v44  ;;  %v2283_v59 = vand.u32 2147483647, %v2144_v45 }
 0x3ae   : > { %v2321_v49 = vsub.f32 1.0, %v2320_v48  ;;  %vm2279_vm15 = vweird.f32 %v2144_v45  ;;  %vm2325_vm2 = vweird.f32 %v5161_v24  ;;  %v2286_v25 = vor.u32 1.1754944e-38, %v2285_v56 }
 0x3af   : > { %v2232_v26 = vmul.f32 %v3784_v35, %v2231_v8  ;;  %2819 = vrot.lane.b32.xlu1 %v2198_v5, %s4008_s24  ;;  %vm2284_vm5 = vcmp.eq.f32.partialorder %v2283_v59, 8.507059e+37  ;;  %vm2326_vm7 = vmor %vm2324_vm6, %vm2325_vm2  ;;  %vm2329_vm8 = vcmp.eq.f32.partialorder %v2328_v57, 8.507059e+37  ;;  %v381_v5 = vld [vmem:[%s4198_s17 + $0x8] sm:$0xff] }
 0x3b0   : > { %v2322_v31 = vmul.f32 %v5161_v24, %v2321_v49  ;;  %v380_v49 = vld [vmem:[%s4198_s17] sm:$0xff]  ;;  %2838 = vmatpush.msra.mxu1 %v381_v5 }
 0x3b1   : > { %v2233_v58 = vadd.f32 %v3784_v35, %v2232_v26  ;;  %2813 = vmatpush.msra.mxu0 %v380_v49  ;;  %v388_v49 = vld [vmem:[%s4198_s17 + $0x40] sm:$0xff] }
 0x3b2   : > { %v3788_v21 = vpop.eup %3787  ;;  %v2323_v12 = vadd.f32 %v5161_v24, %v2322_v31  ;;  %v2361_v31 = vor.u32 1.1754944e-38, %v2360_v11  ;;  %v382_v11 = vld [vmem:[%s4198_s17 + $0x10] sm:$0xff] }
 0x3b3   : > { %v2275_v32 = vmul.f32 %v3788_v21, %v2144_v45  ;;  %vm2280_vm14 = vweird.f32 %v3788_v21  ;;  %v2237_v17 = vsel %vm5184_vm13, %v3784_v35, %v2233_v58  ;;  %v5191_v20 = vpop.eup %3789  ;;  %vm2354_vm13 = vweird.f32 %v5172_v44  ;;  %2863 = vmatpush.msra.mxu2 %v382_v11 }
 0x3b4   : > { %vm2281_vm4 = vmor %vm2279_vm15, %vm2280_vm14  ;;  %v2242_v62 = vsel %vm2239_vm3, %v2241_v7, %v2237_v17  ;;  %v2350_v52 = vmul.f32 %v5191_v20, %v5172_v44  ;;  %v2327_v61 = vsel %vm2326_vm7, %v5161_v24, %v2323_v12  ;;  %vm2355_vm12 = vweird.f32 %v5191_v20 }
 0x3b5   : > { %v2276_v14 = vsub.f32 1.0, %v2275_v32  ;;  %v5177_v13 = vpop.xlane.xlu0 %2149  ;;  %v2243_v10 = vmul.f32 %v4831_v40, %v2242_v62  ;;  %v2332_v35 = vsel %vm2329_vm8, %v2331_v6, %v2327_v61  ;;  %vm5242_vm2 = vmor %vm2354_vm13, %vm2355_vm12  ;;  %vm2359_vm8 = vcmp.eq.f32.partialorder %v2358_v1, 8.507059e+37 }
 0x3b6   : > { %3791 = vrcp.f32 %v5177_v13  ;;  %v2351_v29 = vsub.f32 1.0, %v2350_v52  ;;  %v2315_v45 = vand.u32 2147483648, %v5177_v13  ;;  %vm2309_vm10 = vweird.f32 %v5177_v13 }
 0x3b7   : > { %v2277_v51 = vmul.f32 %v3788_v21, %v2276_v14  ;;  %2844 = vrot.lane.b32.xlu1 %v2213_v15, %s4008_s24  ;;  %v2313_v24 = vand.u32 2147483647, %v5177_v13  ;;  %v2333_v30 = vmul.f32 %v4823_v22, %v2332_v35 }
 0x3b8   : > { %v2352_v40 = vmul.f32 %v5191_v20, %v2351_v29  ;;  %v2316_v22 = vor.u32 1.1754944e-38, %v2315_v45 }
 0x3b9   : > { %v2278_v33 = vadd.f32 %v3788_v21, %v2277_v51  ;;  %vm2314_vm14 = vcmp.eq.f32.partialorder %v2313_v24, 8.507059e+37 }
 0x3bb   : > { %v2282_v37 = vsel %vm2281_vm4, %v3788_v21, %v2278_v33  ;;  %v2353_v21 = vadd.f32 %v5191_v20, %v2352_v40 }
 0x3bc   : > { %v3792_v34 = vpop.eup %3791  ;;  %v2287_v53 = vsel %vm2284_vm5, %v2286_v25, %v2282_v37 }
 0x3bd   : > { %v2305_v9 = vmul.f32 %v3792_v34, %v5177_v13  ;;  %v5202_v54 = vpop.xlane.xlu0 %2164  ;;  %v2156_v63 = vpop.xlane.xlu2 %2155  ;;  %v2288_v19 = vmul.f32 %v4854_v4, %v2287_v53  ;;  %vm2310_vm9 = vweird.f32 %v3792_v34  ;;  %v2357_v51 = vsel %vm5242_vm2, %v5191_v20, %v2353_v21  ;;  %v386_v21 = vld [vmem:[%s4198_s17 + $0x30] sm:$0xff] }
 0x3be   : > { %3793 = vrcp.f32 %v5202_v54  ;;  %vm5227_vm11 = vmor %vm2309_vm10, %vm2310_vm9  ;;  %v2343_v32 = vand.u32 2147483647, %v2156_v63  ;;  %v2345_v58 = vand.u32 2147483648, %v2156_v63  ;;  %vm2339_vm3 = vweird.f32 %v2156_v63  ;;  %2963 = vmatpush.msrb.mxu2 %v386_v21 }
 0x3bf   : > { %v2306_v46 = vsub.f32 1.0, %v2305_v9  ;;  %3795 = vrcp.f32 %v2156_v63  ;;  %2969 = vrot.lane.b32.xlu2 %v2288_v19, %s4008_s24  ;;  %2894 = vrot.lane.b32.xlu1 %v2243_v10, %s4008_s24  ;;  %vm2384_vm7 = vweird.f32 %v5202_v54  ;;  %v2390_v12 = vand.u32 2147483648, %v5202_v54 }
 0x3c0   : > { %vm2344_vm5 = vcmp.eq.f32.partialorder %v2343_v32, 8.507059e+37  ;;  %v2346_v17 = vor.u32 1.1754944e-38, %v2345_v58  ;;  %v2388_v37 = vand.u32 2147483647, %v5202_v54  ;;  %v391_v58 = vld [vmem:[%s4198_s17 + $0x58] sm:$0xff] }
 0x3c1   : > { %v2307_v4 = vmul.f32 %v3792_v34, %v2306_v46  ;;  %v2391_v19 = vor.u32 1.1754944e-38, %v2390_v12 }
 0x3c2   : > { %vm2389_vm12 = vcmp.eq.f32.partialorder %v2388_v37, 8.507059e+37 }
 0x3c3   : > { %v2308_v0 = vadd.f32 %v3792_v34, %v2307_v4 }
 0x3c4   : > { %v5212_v2 = vpop.eup %3793  ;;  %v2590_v28 = vpop.f32.mrf.mxu3 }
 0x3c5   : > { %v3796_v60 = vpop.eup %3795  ;;  %v2380_v43 = vmul.f32 %v5212_v2, %v5202_v54  ;;  %2784 = vst.msk [vmem:[%s4974_s15 + $0x38] sm:$0xff] %vm414_vm0, %v2590_v28  ;;  %v5222_v8 = vpop.xlane.xlu1 %2167  ;;  %v2312_v26 = vsel %vm5227_vm11, %v3792_v34, %v2308_v0  ;;  %vm2385_vm6 = vweird.f32 %v5212_v2 }
 0x3c6   : > { %v5224_v18 = vpop.xlane.xlu2 %2161  ;;  %v2335_v48 = vmul.f32 %v3796_v60, %v2156_v63  ;;  %3797 = vrcp.f32 %v5222_v8  ;;  %vm2340_vm15 = vweird.f32 %v3796_v60  ;;  %v2317_v13 = vsel %vm2314_vm14, %v2316_v22, %v2312_v26  ;;  %vm5261_vm9 = vmor %vm2384_vm7, %vm2385_vm6  ;;  %v384_v26 = vld [vmem:[%s4198_s17 + $0x20] sm:$0xff] }
 0x3c7   : > { %v2381_v23 = vsub.f32 1.0, %v2380_v43  ;;  %3799 = vrcp.f32 %v5224_v18  ;;  %3044 = vrot.lane.b32.xlu2 %v2333_v30, %s4008_s24  ;;  %vm2341_vm4 = vmor %vm2339_vm3, %vm2340_vm15  ;;  %v2318_v33 = vmul.f32 %v4901_v36, %v2317_v13  ;;  %v2405_v34 = vand.u32 2147483648, %v5222_v8  ;;  %2913 = vmatpush.msrb.mxu0 %v384_v26 }
 0x3c8   : > { %v2336_v41 = vsub.f32 1.0, %v2335_v48  ;;  %v2403_v57 = vand.u32 2147483647, %v5222_v8  ;;  %v2362_v63 = vsel %vm2359_vm8, %v2361_v31, %v2357_v51  ;;  %vm2399_vm11 = vweird.f32 %v5222_v8  ;;  %v385_v48 = vld [vmem:[%s4198_s17 + $0x28] sm:$0xff]  ;;  %v390_v51 = vld [vmem:[%s4198_s17 + $0x50] sm:$0xff] }
 0x3c9   : > { %v2382_v42 = vmul.f32 %v5212_v2, %v2381_v23  ;;  %v2363_v46 = vmul.f32 %v4841_v50, %v2362_v63  ;;  %v2375_v35 = vand.u32 2147483648, %v5224_v18  ;;  %vm2369_vm2 = vweird.f32 %v5224_v18  ;;  %2938 = vmatpush.msrb.mxu1 %v385_v48 }
 0x3ca   : > { %v2337_v14 = vmul.f32 %v3796_v60, %v2336_v41  ;;  %vm2404_vm14 = vcmp.eq.f32.partialorder %v2403_v57, 8.507059e+37 }
 0x3cb   : > { %v2383_v25 = vadd.f32 %v5212_v2, %v2382_v42  ;;  %v2376_v28 = vor.u32 1.1754944e-38, %v2375_v35 }
 0x3cc   : > { %v3798_v56 = vpop.eup %3797  ;;  %v2338_v27 = vadd.f32 %v3796_v60, %v2337_v14  ;;  %v389_v14 = vld [vmem:[%s4198_s17 + $0x48] sm:$0xff] }
 0x3cd   : > { %v3800_v59 = vpop.eup %3799  ;;  %v2395_v7 = vmul.f32 %v3798_v56, %v5222_v8  ;;  %vm2400_vm10 = vweird.f32 %v3798_v56  ;;  %v2387_v54 = vsel %vm5261_vm9, %v5212_v2, %v2383_v25  ;;  %v2373_v2 = vand.u32 2147483647, %v5224_v18 }
 0x3ce   : > { %v2365_v44 = vmul.f32 %v3800_v59, %v5224_v18  ;;  %v2342_v38 = vsel %vm2341_vm4, %v3796_v60, %v2338_v27  ;;  %vm2401_vm13 = vmor %vm2399_vm11, %vm2400_vm10  ;;  %v2392_v6 = vsel %vm2389_vm12, %v2391_v19, %v2387_v54  ;;  %vm2370_vm15 = vweird.f32 %v3800_v59 }
 0x3cf   : > { %v2396_v20 = vsub.f32 1.0, %v2395_v7  ;;  %3019 = vrot.lane.b32.xlu2 %v2318_v33, %s4008_s24  ;;  %v2347_v62 = vsel %vm2344_vm5, %v2346_v17, %v2342_v38  ;;  %v2393_v40 = vmul.f32 %v4869_v3, %v2392_v6  ;;  %vm2371_vm3 = vmor %vm2369_vm2, %vm2370_vm15  ;;  %vm2374_vm4 = vcmp.eq.f32.partialorder %v2373_v2, 8.507059e+37  ;;  %v393_v17 = vld [vmem:[%s4198_s17 + $0x68] sm:$0xff]  ;;  %v392_v33 = vld [vmem:[%s4198_s17 + $0x60] sm:$0xff] }
 0x3d0   : > { %v2366_v36 = vsub.f32 1.0, %v2365_v44  ;;  %v2348_v55 = vmul.f32 %v4919_v47, %v2347_v62  ;;  %v2406_v47 = vor.u32 1.1754944e-38, %v2405_v34  ;;  %v394_v44 = vld [vmem:[%s4198_s17 + $0x70] sm:$0xff] }
 0x3d1   : > { %v2397_v53 = vmul.f32 %v3798_v56, %v2396_v20 }
 0x3d2   : > { %v2367_v9 = vmul.f32 %v3800_v59, %v2366_v36  ;;  %3069 = vrot.lane.b32.xlu1 %v2348_v55, %s4008_s24 }
 0x3d3   : > { %v2398_v10 = vadd.f32 %v3798_v56, %v2397_v53 }
 0x3d4   : > { %v2368_v29 = vadd.f32 %v3800_v59, %v2367_v9 }
 0x3d5   : > { %v2402_v61 = vsel %vm2401_vm13, %v3798_v56, %v2398_v10  ;;  %v395_v56 = vld [vmem:[%s4198_s17 + $0x78] sm:$0xff] }
 0x3d6   : > { %v2407_v4 = vsel %vm2404_vm14, %v2406_v47, %v2402_v61  ;;  %v2544_v50 = vpop.f32.mrf.mxu1  ;;  %v2372_v45 = vsel %vm2371_vm3, %v3800_v59, %v2368_v29 }
 0x3d7   : > { %3094 = vrot.lane.b32.xlu2 %v2363_v46, %s4008_s24  ;;  %v2408_v0 = vmul.f32 %v4933_v39, %v2407_v4  ;;  %2782 = vst.msk [vmem:[%s4974_s15 + $0x28] sm:$0xff] %vm414_vm0, %v2544_v50  ;;  %v2377_v39 = vsel %vm2374_vm4, %v2376_v28, %v2372_v45 }
 0x3d8   : > { %v2378_v24 = vmul.f32 %v4856_v16, %v2377_v39  ;;  %v387_v16 = vld [vmem:[%s4198_s17 + $0x38] sm:$0xff] }
 0x3d9   : > { %3169 = vrot.lane.b32.xlu0 %v2408_v0, %s4008_s24  ;;  %2988 = vmatpush.msrb.mxu3 %v387_v16 }
 0x3da   : > { %3144 = vrot.lane.b32.xlu1 %v2393_v40, %s4008_s24  ;;  %v2870_v3 = vpop.permute.xlu2 %2869 }
 0x3db   : > { %v2567_v60 = vpop.f32.mrf.mxu2  ;;  %3479 = vmatmul.msk.f32.vlgmr.msra.gmra.mxu3 %vm975_vm1, %v2870_v3 }
 0x3dc   : > { %2783 = vst.msk [vmem:[%s4974_s15 + $0x30] sm:$0xff] %vm414_vm0, %v2567_v60  ;;  %3088 = vmatpush.msra.mxu3 %v391_v58 }
 0x3e2   : > { %3119 = vrot.lane.b32.xlu1 %v2378_v24, %s4008_s24 }
 0x3e3   : > { %v2682_v43 = vpop.f32.mrf.mxu3 }
 0x3e4   : > { %2788 = vst.msk [vmem:[%s4974_s15 + $0x58] sm:$0xff] %vm414_vm0, %v2682_v43  ;;  %v2659_v8 = vpop.f32.mrf.mxu2 }
 0x3e5   : > { %2787 = vst.msk [vmem:[%s4974_s15 + $0x50] sm:$0xff] %vm414_vm0, %v2659_v8 }
 0x3ea   : > { %v2795_v18 = vpop.permute.xlu0 %2794 }
 0x3eb   : > { %3476 = vmatmul.msk.f32.vlgmr.msra.gmra.mxu0 %vm975_vm1, %v2795_v18 }
 0x3ec   : > { %v2774_v30 = vpop.f32.mrf.mxu3  ;;  %3013 = vmatpush.msra.mxu0 %v388_v49 }
 0x3ed   : > { %2792 = vst.msk [vmem:[%s4974_s15 + $0x78] sm:$0xff] %vm414_vm0, %v2774_v30 }
 0x3f2   : > { %v2920_v31 = vpop.permute.xlu0 %2919 }
 0x3fa   : > { %v2945_v7 = vpop.permute.xlu0 %2944 }
 0x402   : > { %v2995_v12 = vpop.permute.xlu0 %2994 }
 0x40c   : > { %v2521_v23 = vpop.f32.mrf.mxu0 }
 0x40d   : > { %2781 = vst.msk [vmem:[%s4974_s15 + $0x20] sm:$0xff] %vm414_vm0, %v2521_v23 }
 0x414   : > { %v2613_v22 = vpop.f32.mrf.mxu0  ;;  %v2636_v41 = vpop.f32.mrf.mxu1 }
 0x415   : > { %2785 = vst.msk [vmem:[%s4974_s15 + $0x40] sm:$0xff] %vm414_vm0, %v2613_v22 }
 0x416   : > { %2786 = vst.msk [vmem:[%s4974_s15 + $0x48] sm:$0xff] %vm414_vm0, %v2636_v41 }
 0x419   : > { %v2970_v32 = vpop.permute.xlu2 %2969 }
 0x41a   : > { %3483 = vmatmul.msk.f32.vlgmr.msrb.gmra.mxu3 %vm975_vm1, %v2970_v32 }
 0x41b   : > { %3188 = vmatpush.msrb.mxu3 %v395_v56 }
 0x41c   : > { %v2705_v42 = vpop.f32.mrf.mxu0 }
 0x41d   : > { %2789 = vst.msk [vmem:[%s4974_s15 + $0x60] sm:$0xff] %vm414_vm0, %v2705_v42 }
 0x421   : > { %v2820_v13 = vpop.permute.xlu1 %2819  ;;  %v3045_v27 = vpop.permute.xlu2 %3044 }
 0x422   : > { %v2751_v15 = vpop.f32.mrf.mxu2  ;;  %3477 = vmatmul.msk.f32.vlgmr.msra.gmra.mxu1 %vm975_vm1, %v2820_v13 }
 0x423   : > { %2791 = vst.msk [vmem:[%s4974_s15 + $0x70] sm:$0xff] %vm414_vm0, %v2751_v15  ;;  %3038 = vmatpush.msra.mxu1 %v389_v14 }
 0x424   : > { %v2728_v1 = vpop.f32.mrf.mxu1 }
 0x425   : > { %2790 = vst.msk [vmem:[%s4974_s15 + $0x68] sm:$0xff] %vm414_vm0, %v2728_v1 }
 0x429   : > { %v2845_v59 = vpop.permute.xlu1 %2844  ;;  %v3020_v38 = vpop.permute.xlu2 %3019 }
 0x42a   : > { %3478 = vmatmul.msk.f32.vlgmr.msra.gmra.mxu2 %vm975_vm1, %v2845_v59  ;;  %3481 = vmatmul.msk.f32.vlgmr.msrb.gmra.mxu1 %vm975_vm1, %v2920_v31 }
 0x42b   : > { %3063 = vmatpush.msra.mxu2 %v390_v51  ;;  %3138 = vmatpush.msrb.mxu1 %v393_v17 }
 0x431   : > { %v2895_v25 = vpop.permute.xlu1 %2894  ;;  %v3095_v20 = vpop.permute.xlu2 %3094 }
 0x432   : > { %3480 = vmatmul.msk.f32.vlgmr.msrb.gmra.mxu0 %vm975_vm1, %v2895_v25  ;;  %3482 = vmatmul.msk.f32.vlgmr.msrb.gmra.mxu2 %vm975_vm1, %v2945_v7 }
 0x433   : > { %3485 = vmatmul.msk.f32.vlgmr.msra.gmra.mxu1 %vm975_vm1, %v3020_v38  ;;  %3113 = vmatpush.msrb.mxu0 %v392_v33 }
 0x434   : > { %3163 = vmatpush.msrb.mxu2 %v394_v44 }
 0x43a   : > { %3484 = vmatmul.msk.f32.vlgmr.msra.gmra.mxu0 %vm975_vm1, %v2995_v12  ;;  %3486 = vmatmul.msk.f32.vlgmr.msra.gmra.mxu2 %vm975_vm1, %v3045_v27 }
 0x442   : > { %3488 = vmatmul.msk.f32.vlgmr.msrb.gmra.mxu0 %vm975_vm1, %v3095_v20 }
 0x444   : > { %v3070_v62 = vpop.permute.xlu1 %3069 }
 0x445   : > { %3487 = vmatmul.msk.f32.vlgmr.msra.gmra.mxu3 %vm975_vm1, %v3070_v62 }
 0x44b   : > { %v3170_v37 = vpop.permute.xlu0 %3169 }
 0x44c   : > { %v3145_v34 = vpop.permute.xlu1 %3144 }
 0x44d   : > { %3490 = vmatmul.msk.f32.vlgmr.msrb.gmra.mxu2 %vm975_vm1, %v3145_v34  ;;  %3491 = vmatmul.msk.f32.vlgmr.msrb.gmra.mxu3 %vm975_vm1, %v3170_v37 }
 0x454   : > { %v3120_v36 = vpop.permute.xlu1 %3119 }
 0x455   : > { %3489 = vmatmul.msk.f32.vlgmr.msrb.gmra.mxu1 %vm975_vm1, %v3120_v36 }
 0x456   : > { %3928 = shalt.err (!%p3925_p0)
}
 0x457   : > { %s4009_s16 = smov 128   ;;  %s5356_s23 = scalar_lea.vmem [#allocation9], %s4186_s20 }
 0x458   : > { %3511 = dma.vmem_to_hbm [thread:$0]  (%p4086_p11), %s3228_s14, 2048, %s3230_s7, %s3210_s8, %s4009_s16, %s4009_s16, %s4007_s10  }
 0x459   : > { %s3243_s15 = scalar_lea.hbm %s5433_s5, %s3503_s25  ;;  %s3244_s26 = sshll.u32 %s5356_s23, 4  ;;  %s3245_s26 = int_to_ptr.vmem [resolvable:$true] %s3244_s26 }
 0x45a   : > { %s3246_s27 = sshll.u32 %s3243_s15, 4  ;;  %s3215_s12 = scalar_lea.sflag [#allocation10], %s4183_s0  ;;  %s3247_s27 = int_to_ptr.hbm [resolvable:$true] %s3246_s27 }
 0x45b   : > { %s3943_s22 = sshra.s32 %s3247_s27, 4  ;;  %s3949_s8 = scalar_lea.hbm %s5433_s5, 256  ;;  %s3944_s22 = int_to_ptr.hbm [resolvable:$true] %s3943_s22 }
 0x45c   : > { %s3945_s14 = scalar_lea.hbm %s3944_s22, 128  ;;  %p3950_p13 = scmp.lt.s32.totalorder %s3944_s22, %s5433_s5 }
 0x45d   : > { %p3946_p8 = scmp.ne.s32.totalorder %s3944_s22, %s3945_s14  ;;  %p3951_p6 = scmp.lt.s32.totalorder %s3949_s8, %s3945_s14 }
 0x45e   : > { %v2890_v55 = vpop.f32.mrf.mxu3 }
 0x45f   : > { %3196 = vst.msk [vmem:[%s5356_s23 + $0x18] sm:$0xff] %vm414_vm0, %v2890_v55  ;;  %p3947_p10 = pnand %p3946_p8, %p4086_p11  ;;  %p3952_p2 = por %p3951_p6, %p3950_p13 }
 0x461   : > { %p3948_p1 = pneg %p3947_p10 }
 0x463   : > { %p3953_p3 = pnand %p3952_p2, %p3948_p1 }
 0x468   : > { %v2815_v52 = vpop.f32.mrf.mxu0 }
 0x469   : > { %3193 = vst.msk [vmem:[%s5356_s23] sm:$0xff] %vm414_vm0, %v2815_v52 }
 0x49d   : > { %v2990_v53 = vpop.f32.mrf.mxu3 }
 0x49e   : > { %3200 = vst.msk [vmem:[%s5356_s23 + $0x38] sm:$0xff] %vm414_vm0, %v2990_v53 }
 0x49f   : > { %v2840_v57 = vpop.f32.mrf.mxu1 }
 0x4a0   : > { %3194 = vst.msk [vmem:[%s5356_s23 + $0x8] sm:$0xff] %vm414_vm0, %v2840_v57 }
 0x4a7   : > { %v2940_v9 = vpop.f32.mrf.mxu1 }
 0x4a8   : > { %3198 = vst.msk [vmem:[%s5356_s23 + $0x28] sm:$0xff] %vm414_vm0, %v2940_v9 }
 0x4ad   : > { %v2865_v63 = vpop.f32.mrf.mxu2 }
 0x4ae   : > { %3195 = vst.msk [vmem:[%s5356_s23 + $0x10] sm:$0xff] %vm414_vm0, %v2865_v63 }
 0x4af   : > { %v2915_v54 = vpop.f32.mrf.mxu0 }
 0x4b0   : > { %3197 = vst.msk [vmem:[%s5356_s23 + $0x20] sm:$0xff] %vm414_vm0, %v2915_v54  ;;  %v3040_v19 = vpop.f32.mrf.mxu1 }
 0x4b1   : > { %3202 = vst.msk [vmem:[%s5356_s23 + $0x48] sm:$0xff] %vm414_vm0, %v3040_v19 }
 0x4b5   : > { %v2965_v10 = vpop.f32.mrf.mxu2 }
 0x4b6   : > { %3199 = vst.msk [vmem:[%s5356_s23 + $0x30] sm:$0xff] %vm414_vm0, %v2965_v10 }
 0x4b7   : > { %v3015_v47 = vpop.f32.mrf.mxu0 }
 0x4b8   : > { %3201 = vst.msk [vmem:[%s5356_s23 + $0x40] sm:$0xff] %vm414_vm0, %v3015_v47 }
 0x4bd   : > { %v3065_v46 = vpop.f32.mrf.mxu2 }
 0x4be   : > { %3203 = vst.msk [vmem:[%s5356_s23 + $0x50] sm:$0xff] %vm414_vm0, %v3065_v46 }
 0x4bf   : > { %v3115_v61 = vpop.f32.mrf.mxu0 }
 0x4c0   : > { %3205 = vst.msk [vmem:[%s5356_s23 + $0x60] sm:$0xff] %vm414_vm0, %v3115_v61 }
 0x4c8   : > { %v3090_v6 = vpop.f32.mrf.mxu3 }
 0x4c9   : > { %3204 = vst.msk [vmem:[%s5356_s23 + $0x58] sm:$0xff] %vm414_vm0, %v3090_v6 }
 0x4d0   : > { %v3165_v29 = vpop.f32.mrf.mxu2  ;;  %v3190_v4 = vpop.f32.mrf.mxu3 }
 0x4d1   : > { %3207 = vst.msk [vmem:[%s5356_s23 + $0x70] sm:$0xff] %vm414_vm0, %v3165_v29 }
 0x4d2   : > { %3208 = vst.msk [vmem:[%s5356_s23 + $0x78] sm:$0xff] %vm414_vm0, %v3190_v4  ;;  %v3140_v35 = vpop.f32.mrf.mxu1 }
 0x4d3   : > { %3206 = vst.msk [vmem:[%s5356_s23 + $0x68] sm:$0xff] %vm414_vm0, %v3140_v35 }
 0x4d4   : > { %3956 = shalt.err (!%p3953_p3)
}
 0x4d5   : > { %3512 = dma.vmem_to_hbm [thread:$0]  (%p4086_p11), %s3245_s26, 2048, %s3247_s27, %s3215_s12, %s4009_s16, %s4009_s16, %s4007_s10  }
 0x4d6 PF: > { %s3261_s0 = sand.u32 1, %s3991_s18   ;;  %p3526_p4 = pnand %p3410_p9, %p4090_p12 }
 0x4d7   : > { %s3262_s17 = scalar_lea.sflag [#allocation4], %s3261_s0 }
 0x4d8   : > { %p3527_p5 = pneg %p3526_p4 }
 0x4da   : > { %3982 = dma.done.wait (%p3527_p5), %s3262_s17, 2048  }
 0x4db   : > { %3984 = vsyncadd (%p3527_p5), %s3262_s17, 4294965248  ;;  %s3272_s11 = scalar_lea.sflag [#allocation10], %s3261_s0 }
 0x4dc   : > { %3986 = dma.done.wait (%p3527_p5), %s3272_s11, 2048  }
 0x4dd   : > { %3988 = vsyncadd (%p3527_p5), %s3272_s11, 4294965248  ;;  %s5470_s21 = sld [smem:[#allocation16_spill]]  ;;  %s5473_s18 = smov %s3995_s19 }
 0x4de   : > { %s5471_s29 = sld [smem:[#allocation15_spill]] }
 0x4df   : > { %s5472_s20 = sld [smem:[#allocation17_spill]] }
 0x4e3   : > { %p25_p11 = scmp.ge.s32.totalorder %s5470_s21, 4  }
 0x4e4   : > { %s5474_s19 = smov %s5471_s29 }
 0x4e5   :  { %27 = sbr.rel (!%p25_p11) target bundleno = 12 (0xc), region = 125 }
 0x4ea   :  { %3278 = vsyncpa [#allocation3], 1 }
 0x4eb   :  { %3280 = vsyncpa [#allocation3 + $0x1], 1 }
 0x4ec   :  { %3281 = vsyncpa [#allocation6], 1 }
 0x4ed   :  { %3283 = vsyncpa [#allocation6 + $0x1], 1 }
 0x4ee   :  { %3284 = vsyncpa [#allocation4], 1 }
 0x4ef   :  { %3286 = vsyncpa [#allocation4 + $0x1], 1 }
 0x4f0   :  { %3287 = vsyncpa [#allocation10], 1 }
 0x4f1   :  { %3289 = vsyncpa [#allocation10 + $0x1], 1 }

</bundles_post_ra>
